<compile_context>
chip_gen: v7x
topology: tpu7x:2x2x1
jax: 0.10.0
libtpu: 0.0.40
codegen_flags: <defaults>
</compile_context>

<pallas_src>
import functools

import jax
import jax.numpy as jnp
from jax import lax
from jax.experimental import pallas as pl
from jax.experimental.pallas import tpu as pltpu

EPS = 1e-5
NEG_SLOPE = 0.2
LANE = 128


def _bn_train(h, g, be):
    """Training-mode BatchNorm1d folded into one scale/shift per element."""
    mu = jnp.mean(h, axis=0, keepdims=True)
    msq = jnp.mean(h * h, axis=0, keepdims=True)
    var = jnp.maximum(msq - mu * mu, 0.0)     # clamp: cancellation can go < 0
    scale = g * lax.rsqrt(var + EPS)          # rsqrt -> EUP slot (free vs VALU)
    shift = be - mu * scale
    return h * scale + shift


def _leaky_bn(h, g, be):
    """LeakyReLU(0.2) + BatchNorm (f32 VPU math)."""
    h = jnp.maximum(h, NEG_SLOPE * h)         # 2 VALU ops/elem vs 3 for where
    return _bn_train(h, g, be)


def _forward_math(z_f32, w1, b1, g1, be1, w2, b2, g2, be2, w3, b3):
    """bf16-MXU math path shared by the kernel-equivalent reference."""
    h = jnp.dot(z_f32.astype(jnp.bfloat16), w1,
                preferred_element_type=jnp.float32) + b1
    h = _leaky_bn(h, g1, be1)
    h = jnp.dot(h.astype(jnp.bfloat16), w2,
                preferred_element_type=jnp.float32) + b2
    h = _leaky_bn(h, g2, be2)
    return jnp.dot(h.astype(jnp.bfloat16), w3,
                   preferred_element_type=jnp.float32) + b3


def gan_kernel(z_ref,
               w1_ref, b1_ref, g1_ref, be1_ref,
               w2_hbm, b2_ref, g2_ref, be2_ref,
               w3_hbm, b3_ref,
               out_ref,
               w2_buf, w3_buf, sem):
    # Kick off layer-2/3 weight fetches immediately so the ~0.4 MB of HBM
    # traffic hides behind the layer-1 matmul + LeakyReLU + BatchNorm.
    cp2 = pltpu.make_async_copy(w2_hbm, w2_buf, sem.at[0])
    cp3 = pltpu.make_async_copy(w3_hbm, w3_buf, sem.at[1])
    cp2.start()
    cp3.start()

    # ---- Layer 1: Linear(64,256) + LeakyReLU + BN ----
    x = z_ref[...].astype(jnp.bfloat16)       # in-kernel cast (no extra dispatch)
    h = jnp.dot(x, w1_ref[...], preferred_element_type=jnp.float32) + b1_ref[...]
    h = _leaky_bn(h, g1_ref[...], be1_ref[...])

    # ---- Layer 2: Linear(256,512) + LeakyReLU + BN ----
    cp2.wait()
    h = jnp.dot(h.astype(jnp.bfloat16), w2_buf[...],
                preferred_element_type=jnp.float32) + b2_ref[...]
    h = _leaky_bn(h, g2_ref[...], be2_ref[...])

    # ---- Layer 3: Linear(512, out_pad) ----
    cp3.wait()
    out = jnp.dot(h.astype(jnp.bfloat16), w3_buf[...],
                  preferred_element_type=jnp.float32) + b3_ref[...]
    out_ref[...] = out.astype(out_ref.dtype)  # lane-dense (B, 128) unmasked store


def init_params(key, input_dim):
    """Deterministic f32 init mimicking PyTorch defaults (U(-1/sqrt(fan_in), .))."""
    def linear(key, fan_in, fan_out):
        kw, kb = jax.random.split(key)
        bound = 1.0 / jnp.sqrt(fan_in)
        w = jax.random.uniform(kw, (fan_in, fan_out), jnp.float32, -bound, bound)
        b = jax.random.uniform(kb, (1, fan_out), jnp.float32, -bound, bound)
        return w, b

    k1, k2, k3 = jax.random.split(key, 3)
    w1, b1 = linear(k1, 64, 256)
    w2, b2 = linear(k2, 256, 512)
    w3, b3 = linear(k3, 512, input_dim)
    g1, be1 = jnp.ones((1, 256), jnp.float32), jnp.zeros((1, 256), jnp.float32)
    g2, be2 = jnp.ones((1, 512), jnp.float32), jnp.zeros((1, 512), jnp.float32)
    return (w1, b1, g1, be1, w2, b2, g2, be2, w3, b3)


def prepare_params(params, input_dim):
    """Cast matmul weights to bf16 and zero-pad the final layer to 128 lanes."""
    (w1, b1, g1, be1, w2, b2, g2, be2, w3, b3) = params
    out_pad = max(LANE, ((input_dim + LANE - 1) // LANE) * LANE)
    w3p = jnp.zeros((w3.shape[0], out_pad), jnp.float32).at[:, :input_dim].set(w3)
    b3p = jnp.zeros((1, out_pad), jnp.float32).at[:, :input_dim].set(b3)
    return (w1.astype(jnp.bfloat16), b1, g1, be1,
            w2.astype(jnp.bfloat16), b2, g2, be2,
            w3p.astype(jnp.bfloat16), b3p), out_pad


@functools.partial(jax.jit, static_argnums=(2, 3))
def enhanced_lottery_gan(z, kparams, input_dim, out_pad):
    """Full generator forward pass in a single fused (jitted) Pallas kernel."""
    B = z.shape[0]
    (w1, b1, g1, be1, w2, b2, g2, be2, w3, b3) = kparams
    args = (z, w1, b1, g1, be1, w2, b2, g2, be2, w3, b3)

    vmem = pl.BlockSpec(memory_space=pltpu.MemorySpace.VMEM)
    hbm = pl.BlockSpec(memory_space=pl.ANY)      # raw ref; DMA'd manually
    in_specs = [vmem,                             # z
                vmem, vmem, vmem, vmem,           # w1, b1, g1, be1
                hbm, vmem, vmem, vmem,            # w2 (manual DMA), b2, g2, be2
                hbm, vmem]                        # w3 (manual DMA), b3

    cost = pl.CostEstimate(
        flops=2 * B * (64 * 256 + 256 * 512 + 512 * out_pad),
        transcendentals=256 + 512,               # the two rsqrt row-vectors
        bytes_accessed=1_000_000)

    out_padded = pl.pallas_call(
        gan_kernel,
        out_shape=jax.ShapeDtypeStruct((B, out_pad), jnp.float32),
        in_specs=in_specs,
        out_specs=vmem,
        scratch_shapes=[
            pltpu.VMEM((256, 512), jnp.bfloat16),     # w2 staging buffer
            pltpu.VMEM((512, out_pad), jnp.bfloat16), # w3 staging buffer
            pltpu.SemaphoreType.DMA((2,)),
        ],
        cost_estimate=cost,
    )(*args)
    return out_padded[:, :input_dim]


def reference_forward_bf16(z, kparams, input_dim):
    """Pure-JAX reference with the identical bf16 math path (tight check)."""
    out = _forward_math(z, *kparams)
    return out[:, :input_dim]


def reference_forward_f32(z, params, input_dim):
    """Independent f32 / centered-variance reference (PyTorch semantics)."""
    (w1, b1, g1, be1, w2, b2, g2, be2, w3, b3) = params

    def bn(h, g, be):
        mu = jnp.mean(h, axis=0, keepdims=True)
        var = jnp.mean((h - mu) ** 2, axis=0, keepdims=True)
        return (h - mu) / jnp.sqrt(var + EPS) * g + be

    h = z @ w1 + b1
    h = jnp.where(h > 0, h, NEG_SLOPE * h)
    h = bn(h, g1, be1)
    h = h @ w2 + b2
    h = jnp.where(h > 0, h, NEG_SLOPE * h)
    h = bn(h, g2, be2)
    return h @ w3 + b3


if __name__ == "__main__":
    B = 128         # fills MXU rows; multiple of 16 for bf16 sublane packing
    LATENT = 64     # generator latent dim (fixed by the module)
    INPUT_DIM = 10  # `input_dim` of the original module (e.g. lottery numbers)

    key = jax.random.PRNGKey(0)
    kz, kp = jax.random.split(key)
    z = jax.random.normal(kz, (B, LATENT), jnp.float32)
    params = init_params(kp, INPUT_DIM)
    kparams, out_pad = prepare_params(params, INPUT_DIM)

    out = enhanced_lottery_gan(z, kparams, INPUT_DIM, out_pad)
    out = jax.block_until_ready(out)
    assert out.shape == (B, INPUT_DIM)

    # Tight check: same bf16 math path -> validates kernel plumbing/DMA.
    ref_bf16 = reference_forward_bf16(z, kparams, INPUT_DIM)
    assert jnp.allclose(out, ref_bf16, atol=2e-3, rtol=2e-3), \
        "mismatch vs bf16-path reference"

    # Loose check: independent f32 / PyTorch-semantics reference -> validates
    # that the deliberate bf16 MXU operands stay within acceptable drift.
    ref_f32 = reference_forward_f32(z, params, INPUT_DIM)
    assert jnp.allclose(out, ref_f32, atol=1e-1, rtol=1e-1), \
        "mismatch vs f32 PyTorch-semantics reference"

    print("KERNEL_OK")
</pallas_src>

<mosaic_0001>
module attributes {stable_mosaic.version = 11 : i64} {
  func.func @gan_kernel(%arg0: memref<128x64xf32, #tpu.memory_space<vmem>>, %arg1: memref<64x256xbf16, #tpu.memory_space<vmem>>, %arg2: memref<1x256xf32, #tpu.memory_space<vmem>>, %arg3: memref<1x256xf32, #tpu.memory_space<vmem>>, %arg4: memref<1x256xf32, #tpu.memory_space<vmem>>, %arg5: memref<256x512xbf16, #tpu.memory_space<any>>, %arg6: memref<1x512xf32, #tpu.memory_space<vmem>>, %arg7: memref<1x512xf32, #tpu.memory_space<vmem>>, %arg8: memref<1x512xf32, #tpu.memory_space<vmem>>, %arg9: memref<512x128xbf16, #tpu.memory_space<any>>, %arg10: memref<1x128xf32, #tpu.memory_space<vmem>>, %arg11: memref<128x128xf32, #tpu.memory_space<vmem>>, %arg12: memref<256x512xbf16, #tpu.memory_space<vmem>>, %arg13: memref<512x128xbf16, #tpu.memory_space<vmem>>, %arg14: memref<2x!tpu.dma_semaphore, #tpu.memory_space<semaphore_mem>>) attributes {dimension_semantics = [], scalar_prefetch = 0 : i64, scratch_operands = 3 : i64, tpu.core_type = #tpu.core_type<tc>} {
    %c0_i32 = arith.constant 0 : i32
    %0 = tpu.memref_slice %arg14[%c0_i32] : memref<2x!tpu.dma_semaphore, #tpu.memory_space<semaphore_mem>> -> memref<1x!tpu.dma_semaphore, #tpu.memory_space<semaphore_mem>>
    %1 = tpu.memref_squeeze %0 : memref<1x!tpu.dma_semaphore, #tpu.memory_space<semaphore_mem>> -> memref<!tpu.dma_semaphore, #tpu.memory_space<semaphore_mem>>
    tpu.enqueue_dma source(%arg5 : memref<256x512xbf16, #tpu.memory_space<any>>) target(%arg12 : memref<256x512xbf16, #tpu.memory_space<vmem>>) target_semaphore(%1 : memref<!tpu.dma_semaphore, #tpu.memory_space<semaphore_mem>>)
    %c1_i32 = arith.constant 1 : i32
    %2 = tpu.memref_slice %arg14[%c1_i32] : memref<2x!tpu.dma_semaphore, #tpu.memory_space<semaphore_mem>> -> memref<1x!tpu.dma_semaphore, #tpu.memory_space<semaphore_mem>>
    %3 = tpu.memref_squeeze %2 : memref<1x!tpu.dma_semaphore, #tpu.memory_space<semaphore_mem>> -> memref<!tpu.dma_semaphore, #tpu.memory_space<semaphore_mem>>
    tpu.enqueue_dma source(%arg9 : memref<512x128xbf16, #tpu.memory_space<any>>) target(%arg13 : memref<512x128xbf16, #tpu.memory_space<vmem>>) target_semaphore(%3 : memref<!tpu.dma_semaphore, #tpu.memory_space<semaphore_mem>>)
    %c0 = arith.constant 0 : index
    %c0_0 = arith.constant 0 : index
    %4 = vector.load %arg0[%c0, %c0_0] : memref<128x64xf32, #tpu.memory_space<vmem>>, vector<128x64xf32>
    %5 = arith.truncf %4 : vector<128x64xf32> to vector<128x64xbf16>
    %c0_1 = arith.constant 0 : index
    %c0_2 = arith.constant 0 : index
    %6 = vector.load %arg1[%c0_1, %c0_2] : memref<64x256xbf16, #tpu.memory_space<vmem>>, vector<64x256xbf16>
    %cst = arith.constant dense<0.000000e+00> : vector<128x256xf32>
    %7 = tpu.matmul %5, %6, %cst {dimension_numbers = #tpu.dot_dimension_numbers<[1], [0], [0], [1], [0, 0, 1, 1], [], []>} : vector<128x64xbf16>, vector<64x256xbf16>, vector<128x256xf32> -> vector<128x256xf32>
    %c0_3 = arith.constant 0 : index
    %c0_4 = arith.constant 0 : index
    %8 = vector.load %arg2[%c0_3, %c0_4] : memref<1x256xf32, #tpu.memory_space<vmem>>, vector<1x256xf32>
    %9 = vector.broadcast %8 : vector<1x256xf32> to vector<128x256xf32>
    %10 = arith.addf %7, %9 : vector<128x256xf32>
    %c0_5 = arith.constant 0 : index
    %c0_6 = arith.constant 0 : index
    %11 = vector.load %arg3[%c0_5, %c0_6] : memref<1x256xf32, #tpu.memory_space<vmem>>, vector<1x256xf32>
    %c0_7 = arith.constant 0 : index
    %c0_8 = arith.constant 0 : index
    %12 = vector.load %arg4[%c0_7, %c0_8] : memref<1x256xf32, #tpu.memory_space<vmem>>, vector<1x256xf32>
    %cst_9 = arith.constant 2.000000e-01 : f32
    %13 = vector.broadcast %cst_9 : f32 to vector<128x256xf32>
    %14 = arith.mulf %13, %10 : vector<128x256xf32>
    %15 = arith.maximumf %10, %14 : vector<128x256xf32>
    %cst_10 = arith.constant dense<0.000000e+00> : vector<256xf32>
    %16 = vector.multi_reduction <add>, %15, %cst_10 [0] : vector<128x256xf32> to vector<256xf32>
    %17 = vector.shape_cast %16 : vector<256xf32> to vector<1x256xf32>
    %cst_11 = arith.constant 1.280000e+02 : f32
    %18 = vector.broadcast %cst_11 : f32 to vector<1x256xf32>
    %19 = arith.divf %17, %18 : vector<1x256xf32>
    %20 = arith.mulf %15, %15 : vector<128x256xf32>
    %cst_12 = arith.constant dense<0.000000e+00> : vector<256xf32>
    %21 = vector.multi_reduction <add>, %20, %cst_12 [0] : vector<128x256xf32> to vector<256xf32>
    %22 = vector.shape_cast %21 : vector<256xf32> to vector<1x256xf32>
    %cst_13 = arith.constant 1.280000e+02 : f32
    %23 = vector.broadcast %cst_13 : f32 to vector<1x256xf32>
    %24 = arith.divf %22, %23 : vector<1x256xf32>
    %25 = arith.mulf %19, %19 : vector<1x256xf32>
    %26 = arith.subf %24, %25 : vector<1x256xf32>
    %cst_14 = arith.constant 0.000000e+00 : f32
    %27 = vector.broadcast %cst_14 : f32 to vector<1x256xf32>
    %28 = arith.maximumf %26, %27 : vector<1x256xf32>
    %cst_15 = arith.constant 9.99999974E-6 : f32
    %29 = vector.broadcast %cst_15 : f32 to vector<1x256xf32>
    %30 = arith.addf %28, %29 : vector<1x256xf32>
    %31 = math.rsqrt %30 : vector<1x256xf32>
    %32 = arith.mulf %11, %31 : vector<1x256xf32>
    %33 = arith.mulf %19, %32 : vector<1x256xf32>
    %34 = arith.subf %12, %33 : vector<1x256xf32>
    %35 = vector.broadcast %32 : vector<1x256xf32> to vector<128x256xf32>
    %36 = arith.mulf %15, %35 : vector<128x256xf32>
    %37 = vector.broadcast %34 : vector<1x256xf32> to vector<128x256xf32>
    %38 = arith.addf %36, %37 : vector<128x256xf32>
    %c0_i32_16 = arith.constant 0 : i32
    %39 = tpu.memref_slice %arg14[%c0_i32_16] : memref<2x!tpu.dma_semaphore, #tpu.memory_space<semaphore_mem>> -> memref<1x!tpu.dma_semaphore, #tpu.memory_space<semaphore_mem>>
    %40 = tpu.memref_squeeze %39 : memref<1x!tpu.dma_semaphore, #tpu.memory_space<semaphore_mem>> -> memref<!tpu.dma_semaphore, #tpu.memory_space<semaphore_mem>>
    tpu.wait_dma2 semaphore(%40 : memref<!tpu.dma_semaphore, #tpu.memory_space<semaphore_mem>>) src(%arg5 : memref<256x512xbf16, #tpu.memory_space<any>>) dst(%arg12 : memref<256x512xbf16, #tpu.memory_space<vmem>>)
    %41 = arith.truncf %38 : vector<128x256xf32> to vector<128x256xbf16>
    %c0_17 = arith.constant 0 : index
    %c0_18 = arith.constant 0 : index
    %42 = vector.load %arg12[%c0_17, %c0_18] : memref<256x512xbf16, #tpu.memory_space<vmem>>, vector<256x512xbf16>
    %cst_19 = arith.constant dense<0.000000e+00> : vector<128x512xf32>
    %43 = tpu.matmul %41, %42, %cst_19 {dimension_numbers = #tpu.dot_dimension_numbers<[1], [0], [0], [1], [0, 0, 1, 1], [], []>} : vector<128x256xbf16>, vector<256x512xbf16>, vector<128x512xf32> -> vector<128x512xf32>
    %c0_20 = arith.constant 0 : index
    %c0_21 = arith.constant 0 : index
    %44 = vector.load %arg6[%c0_20, %c0_21] : memref<1x512xf32, #tpu.memory_space<vmem>>, vector<1x512xf32>
    %45 = vector.broadcast %44 : vector<1x512xf32> to vector<128x512xf32>
    %46 = arith.addf %43, %45 : vector<128x512xf32>
    %c0_22 = arith.constant 0 : index
    %c0_23 = arith.constant 0 : index
    %47 = vector.load %arg7[%c0_22, %c0_23] : memref<1x512xf32, #tpu.memory_space<vmem>>, vector<1x512xf32>
    %c0_24 = arith.constant 0 : index
    %c0_25 = arith.constant 0 : index
    %48 = vector.load %arg8[%c0_24, %c0_25] : memref<1x512xf32, #tpu.memory_space<vmem>>, vector<1x512xf32>
    %cst_26 = arith.constant 2.000000e-01 : f32
    %49 = vector.broadcast %cst_26 : f32 to vector<128x512xf32>
    %50 = arith.mulf %49, %46 : vector<128x512xf32>
    %51 = arith.maximumf %46, %50 : vector<128x512xf32>
    %cst_27 = arith.constant dense<0.000000e+00> : vector<512xf32>
    %52 = vector.multi_reduction <add>, %51, %cst_27 [0] : vector<128x512xf32> to vector<512xf32>
    %53 = vector.shape_cast %52 : vector<512xf32> to vector<1x512xf32>
    %cst_28 = arith.constant 1.280000e+02 : f32
    %54 = vector.broadcast %cst_28 : f32 to vector<1x512xf32>
    %55 = arith.divf %53, %54 : vector<1x512xf32>
    %56 = arith.mulf %51, %51 : vector<128x512xf32>
    %cst_29 = arith.constant dense<0.000000e+00> : vector<512xf32>
    %57 = vector.multi_reduction <add>, %56, %cst_29 [0] : vector<128x512xf32> to vector<512xf32>
    %58 = vector.shape_cast %57 : vector<512xf32> to vector<1x512xf32>
    %cst_30 = arith.constant 1.280000e+02 : f32
    %59 = vector.broadcast %cst_30 : f32 to vector<1x512xf32>
    %60 = arith.divf %58, %59 : vector<1x512xf32>
    %61 = arith.mulf %55, %55 : vector<1x512xf32>
    %62 = arith.subf %60, %61 : vector<1x512xf32>
    %cst_31 = arith.constant 0.000000e+00 : f32
    %63 = vector.broadcast %cst_31 : f32 to vector<1x512xf32>
    %64 = arith.maximumf %62, %63 : vector<1x512xf32>
    %cst_32 = arith.constant 9.99999974E-6 : f32
    %65 = vector.broadcast %cst_32 : f32 to vector<1x512xf32>
    %66 = arith.addf %64, %65 : vector<1x512xf32>
    %67 = math.rsqrt %66 : vector<1x512xf32>
    %68 = arith.mulf %47, %67 : vector<1x512xf32>
    %69 = arith.mulf %55, %68 : vector<1x512xf32>
    %70 = arith.subf %48, %69 : vector<1x512xf32>
    %71 = vector.broadcast %68 : vector<1x512xf32> to vector<128x512xf32>
    %72 = arith.mulf %51, %71 : vector<128x512xf32>
    %73 = vector.broadcast %70 : vector<1x512xf32> to vector<128x512xf32>
    %74 = arith.addf %72, %73 : vector<128x512xf32>
    %c1_i32_33 = arith.constant 1 : i32
    %75 = tpu.memref_slice %arg14[%c1_i32_33] : memref<2x!tpu.dma_semaphore, #tpu.memory_space<semaphore_mem>> -> memref<1x!tpu.dma_semaphore, #tpu.memory_space<semaphore_mem>>
    %76 = tpu.memref_squeeze %75 : memref<1x!tpu.dma_semaphore, #tpu.memory_space<semaphore_mem>> -> memref<!tpu.dma_semaphore, #tpu.memory_space<semaphore_mem>>
    tpu.wait_dma2 semaphore(%76 : memref<!tpu.dma_semaphore, #tpu.memory_space<semaphore_mem>>) src(%arg9 : memref<512x128xbf16, #tpu.memory_space<any>>) dst(%arg13 : memref<512x128xbf16, #tpu.memory_space<vmem>>)
    %77 = arith.truncf %74 : vector<128x512xf32> to vector<128x512xbf16>
    %c0_34 = arith.constant 0 : index
    %c0_35 = arith.constant 0 : index
    %78 = vector.load %arg13[%c0_34, %c0_35] : memref<512x128xbf16, #tpu.memory_space<vmem>>, vector<512x128xbf16>
    %cst_36 = arith.constant dense<0.000000e+00> : vector<128x128xf32>
    %79 = tpu.matmul %77, %78, %cst_36 {dimension_numbers = #tpu.dot_dimension_numbers<[1], [0], [0], [1], [0, 0, 1, 1], [], []>} : vector<128x512xbf16>, vector<512x128xbf16>, vector<128x128xf32> -> vector<128x128xf32>
    %c0_37 = arith.constant 0 : index
    %c0_38 = arith.constant 0 : index
    %80 = vector.load %arg10[%c0_37, %c0_38] : memref<1x128xf32, #tpu.memory_space<vmem>>, vector<1x128xf32>
    %81 = vector.broadcast %80 : vector<1x128xf32> to vector<128x128xf32>
    %82 = arith.addf %79, %81 : vector<128x128xf32>
    %c0_39 = arith.constant 0 : index
    %c0_40 = arith.constant 0 : index
    %83 = vector.load %arg11[%c0_39, %c0_40] : memref<128x128xf32, #tpu.memory_space<vmem>>, vector<128x128xf32>
    tpu.vector_store %arg11[%c0_39, %c0_40], %82 {strides = array<i32>} : memref<128x128xf32, #tpu.memory_space<vmem>>, vector<128x128xf32>,
    return
  }
}

</mosaic_0001>

<bundles_post_ra>
// kernel: enhanced_lottery_gan.1
= control target key start
LH: loop header
LB: loop body
LE: loop exit
PB: predicated region body
PF: predicated region fallthrough
CT: control target
= control target key end

     0   :  { %s39_s17 = sld [smem:[#allocation0]]   ;;  %s2112_s18 = smov [#allocation2]   ;;  %v2113_v0 = vmov 0   ;;  %vm166_vm0 = vcmask 523264   ;;  %v116_v33 = vlaneseq  ;;  %s3832_s0 = inlined_call_operand.vmem [shape: f32[128,64], index: 0, kind: input, shape index: {}]   ;;  %s3833_s1 = inlined_call_operand.vmem [shape: bf16[64,256], index: 1, kind: input, shape index: {}]   ;;  %s3834_s2 = inlined_call_operand.vmem [shape: f32[1,256], index: 2, kind: input, shape index: {}]   ;;  %s3835_s3 = inlined_call_operand.vmem [shape: f32[1,256], index: 3, kind: input, shape index: {}]   ;;  %s3836_s4 = inlined_call_operand.vmem [shape: f32[1,256], index: 4, kind: input, shape index: {}]   ;;  %s3837_s5 = inlined_call_operand.hbm [shape: bf16[256,512], index: 5, kind: input, shape index: {}]   ;;  %s3838_s6 = inlined_call_operand.vmem [shape: f32[1,512], index: 6, kind: input, shape index: {}]   ;;  %s3839_s7 = inlined_call_operand.vmem [shape: f32[1,512], index: 7, kind: input, shape index: {}]   ;;  %s3840_s8 = inlined_call_operand.vmem [shape: f32[1,512], index: 8, kind: input, shape index: {}]   ;;  %s3841_s9 = inlined_call_operand.hbm [shape: bf16[512,128], index: 9, kind: input, shape index: {}]   ;;  %s3842_s10 = inlined_call_operand.vmem [shape: f32[1,128], index: 10, kind: input, shape index: {}]   ;;  %s3843_s11 = inlined_call_operand.vmem [shape: f32[128,128], index: 11, kind: output, shape index: {}]  }
   0x1   :  { %s47_s19 = sshll.u32 %s2112_s18, 4  ;;  %223 = vmatprep.mubr.bf16.mxu0 %v2113_v0  ;;  %s2114_s20 = smov 512   ;;  %s48_s19 = int_to_ptr.vmem [resolvable:$true] %s47_s19 }
   0x2   :  { %51 = sst [smem:[#allocation6]] %s2114_s20  ;;  %s2115_s21 = smov 4   ;;  %v2275_v34 = vshrl.u32 %v116_v33, 7 }
   0x3   :  { %53 = sst [smem:[#allocation6 + $0x1]] %s2114_s20  ;;  %s2116_s22 = smov 64  }
   0x4   :  { %55 = sst [smem:[#allocation6 + $0x2]] %s2115_s21  ;;  %s2117_s24 = smov 128   ;;  %v2278_v35 = vsub.s32 0, %v2275_v34  ;;  %v2284_v38 = vsub.s32 1, %v2275_v34 }
   0x5   :  { %57 = sst [smem:[#allocation6 + $0x3]] %s2116_s22  ;;  %s2118_s26 = smov 2  }
   0x6   :  { %s1885_s23 = sshll.u32 %s39_s17, 26  ;;  %59 = sst [smem:[#allocation6 + $0x4]] %s2117_s24 }
   0x7   :  { %s1886_s25 = sadd.s32 134217728, %s1885_s23  ;;  %61 = sst [smem:[#allocation6 + $0x5]] %s2118_s26 }
   0x8   :  { %s2119_s27 = smov 256   ;;  %65 = sst [smem:[#allocation6 + $0x7]] %s2116_s22 }
   0x9   :  { %63 = sst [smem:[#allocation6 + $0x6]] %s2119_s27  ;;  %s2120_s28 = smov [#allocation4]  }
   0xa   :  { %67 = sst [smem:[#allocation6 + $0x8]] %s2115_s21  ;;  %s2121_s29 = smov [#allocation5]  }
   0xb   :  { %69 = dma.general %s3837_s5, 8192, %s48_s19, %s2120_s28, %s2121_s29, [#allocation6], %s1886_s25, 0  }
   0xc   :  { %v2062_v1 = vld [vmem:[%s3833_s1 + $0x4] ss:$8 sps:$4 sm:$0xff]   ;;  %v2064_v2 = vld [vmem:[%s3833_s1] ss:$8 sps:$4 sm:$0xff]   ;;  %v2065_v3 = vld [vmem:[%s3833_s1 + $0x14] ss:$8 sps:$4 sm:$0xff]  }
   0xd   :  { %191 = vmatprep.subr.bf16.mxu0 %v2062_v1  ;;  %v2067_v4 = vld [vmem:[%s3833_s1 + $0x10] ss:$8 sps:$4 sm:$0xff]   ;;  %v2068_v5 = vld [vmem:[%s3833_s1 + $0x24] ss:$8 sps:$4 sm:$0xff]   ;;  %v2070_v6 = vld [vmem:[%s3833_s1 + $0x20] ss:$8 sps:$4 sm:$0xff]  }
   0xe   :  { %192 = vmatpush1.bf16.msra.mxu0 %v2064_v2  ;;  %v2071_v7 = vld [vmem:[%s3833_s1 + $0x34] ss:$8 sps:$4 sm:$0xff]   ;;  %v2073_v8 = vld [vmem:[%s3833_s1 + $0x30] ss:$8 sps:$4 sm:$0xff]   ;;  %v82_v9 = vld [vmem:[%s3832_s0] sm:$0xff] }
   0xf   :  { %193 = vmatprep.subr.bf16.mxu0 %v2065_v3  ;;  %v83_v10 = vld [vmem:[%s3832_s0 + $0x8] sm:$0xff]  ;;  %v84_v12 = vld [vmem:[%s3832_s0 + $0x10] sm:$0xff]  ;;  %v85_v13 = vld [vmem:[%s3832_s0 + $0x18] sm:$0xff] }
  0x10   :  { %v98_v11 = vpack.c.bf16 %v83_v10, %v82_v9  ;;  %v99_v14 = vpack.c.bf16 %v85_v13, %v84_v12  ;;  %v86_v15 = vld [vmem:[%s3832_s0 + $0x20] sm:$0xff]  ;;  %v87_v16 = vld [vmem:[%s3832_s0 + $0x28] sm:$0xff]  ;;  %v88_v18 = vld [vmem:[%s3832_s0 + $0x30] sm:$0xff] }
  0x11   :  { %v100_v17 = vpack.c.bf16 %v87_v16, %v86_v15  ;;  %v89_v19 = vld [vmem:[%s3832_s0 + $0x38] sm:$0xff]  ;;  %v90_v21 = vld [vmem:[%s3832_s0 + $0x40] sm:$0xff]  ;;  %v91_v22 = vld [vmem:[%s3832_s0 + $0x48] sm:$0xff] }
  0x12   :  { %194 = vmatpush1.bf16.msra.mxu0 %v2067_v4  ;;  %v101_v20 = vpack.c.bf16 %v89_v19, %v88_v18  ;;  %v102_v23 = vpack.c.bf16 %v91_v22, %v90_v21  ;;  %v92_v24 = vld [vmem:[%s3832_s0 + $0x50] sm:$0xff]  ;;  %v93_v25 = vld [vmem:[%s3832_s0 + $0x58] sm:$0xff]  ;;  %v94_v27 = vld [vmem:[%s3832_s0 + $0x60] sm:$0xff] }
  0x13   :  { %195 = vmatprep.subr.bf16.mxu0 %v2068_v5  ;;  %v103_v26 = vpack.c.bf16 %v93_v25, %v92_v24  ;;  %v95_v28 = vld [vmem:[%s3832_s0 + $0x68] sm:$0xff]  ;;  %v96_v30 = vld [vmem:[%s3832_s0 + $0x70] sm:$0xff]  ;;  %v97_v31 = vld [vmem:[%s3832_s0 + $0x78] sm:$0xff]  ;;  %s2122_s0 = smov [#allocation3]  }
  0x14   :  { %v104_v29 = vpack.c.bf16 %v95_v28, %v94_v27  ;;  %v105_v32 = vpack.c.bf16 %v97_v31, %v96_v30  ;;  %v114_v36 = vld [vmem:[%s3834_s2] sm:$0x3]  ;;  %s78_s5 = sshll.u32 %s2122_s0, 4  ;;  %s2086_s2 = scalar_lea.hbm %s3841_s9, 4096  ;;  %s79_s5 = int_to_ptr.vmem [resolvable:$true] %s78_s5 }
  0x15   :  { %v2287_v41 = vrot.slane %v114_v36, %v2278_v35  ;;  %v2290_v43 = vrot.slane %v114_v36, %v2284_v38  ;;  %p2087_p0 = scmp.ne.s32.totalorder %s3841_s9, %s2086_s2  ;;  %p2090_p1 = scmp.lt.u32.totalorder %s2086_s2, %s3841_s9 }
  0x16   :  { %196 = vmatpush1.bf16.msra.mxu0 %v2070_v6 }
  0x17   :  { %197 = vmatprep.subr.bf16.mxu0 %v2071_v7  ;;  %p2092_p2 = pnand %p2090_p1, %p2087_p0 }
  0x1a   :  { %198 = vmatpush1.bf16.msra.mxu0 %v2073_v8 }
  0x1d   :  { %1895 = vmatmul.mubr.msk.bf16.vlgmr.msra.gmra.mrb[0].mxu0 %vm166_vm0, %v98_v11 }
  0x1e   :  { %233 = vmatprep.mubr.bf16.mxu0 %v2113_v0 }
  0x25   :  { %1896 = vmatmul.mubr.msk.bf16.gmra.mrb[4].mxu0 %vm166_vm0, %v99_v14 }
  0x26   :  { %243 = vmatprep.mubr.bf16.mxu0 %v2113_v0 }
  0x2d   :  { %1897 = vmatmul.mubr.msk.bf16.gmra.mrb[8].mxu0 %vm166_vm0, %v100_v17 }
  0x2e   :  { %253 = vmatprep.mubr.bf16.mxu0 %v2113_v0 }
  0x35   :  { %1898 = vmatmul.mubr.msk.bf16.gmra.mrb[12].mxu0 %vm166_vm0, %v101_v20 }
  0x36   :  { %263 = vmatprep.mubr.bf16.mxu0 %v2113_v0 }
  0x3d   :  { %1899 = vmatmul.mubr.msk.bf16.gmra.mrb[16].mxu0 %vm166_vm0, %v102_v23 }
  0x3e   :  { %273 = vmatprep.mubr.bf16.mxu0 %v2113_v0 }
  0x45   :  { %1900 = vmatmul.mubr.msk.bf16.gmra.mrb[20].mxu0 %vm166_vm0, %v103_v26 }
  0x46   :  { %283 = vmatprep.mubr.bf16.mxu0 %v2113_v0 }
  0x4d   :  { %1901 = vmatmul.mubr.msk.bf16.gmra.mrb[24].mxu0 %vm166_vm0, %v104_v29 }
  0x4e   :  { %293 = vmatprep.mubr.bf16.mxu0 %v2113_v0 }
  0x55   :  { %1902 = vmatmul.mubr.msk.bf16.gmra.mrb[28].mxu0 %vm166_vm0, %v105_v32 }
  0xf0   :  { %v225_v37 = vpop.f32.mrb[0].mxu0 }
  0xf1   :  { %v227_v39 = vpop.f32.mrb[1].mxu0 }
  0xf2   :  { %v229_v40 = vpop.f32.mrb[2].mxu0 }
  0xf3   :  { %v231_v42 = vpop.f32.mrb[3].mxu0 }
  0xf4   :  { %2095 = shalt.err (!%p2092_p2)  }
  0xf5   :  { %s2096_s27 = scalar_lea.vmem %s79_s5, 4096  ;;  %p2101_p4 = scmp.lt.s32.totalorder %s79_s5, %s79_s5 }
  0xf6   :  { %p2097_p3 = scmp.ne.s32.totalorder %s79_s5, %s2096_s27  ;;  %p2102_p5 = scmp.lt.s32.totalorder %s2096_s27, %s2096_s27 }
  0xf8   :  { %p2103_p6 = por %p2102_p5, %p2101_p4 }
  0xfa   :  { %p2104_p7 = pnand %p2103_p6, %p2097_p3 }
  0xfc   :  { %2107 = shalt.err (!%p2104_p7)  }
  0xfd   :  { %81 = dma.hbm_to_vmem [thread:$0]  %s3841_s9, 4096, %s79_s5, [#allocation4 + $0x1]  ;;  %v226_v44 = vadd.f32 %v225_v37, %v2287_v41  ;;  %v230_v45 = vadd.f32 %v229_v40, %v2287_v41  ;;  %v228_v46 = vadd.f32 %v227_v39, %v2290_v43  ;;  %v232_v47 = vadd.f32 %v231_v42, %v2290_v43  ;;  %v235_v48 = vpop.f32.mrb[4].mxu0 }
  0xfe   :  { %v236_v49 = vadd.f32 %v235_v48, %v2287_v41  ;;  %v237_v50 = vpop.f32.mrb[5].mxu0 }
  0xff   :  { %v239_v51 = vpop.f32.mrb[6].mxu0  ;;  %v306_v52 = vmul.f32 0.2, %v226_v44  ;;  %v308_v53 = vmul.f32 0.2, %v230_v45  ;;  %v238_v54 = vadd.f32 %v237_v50, %v2290_v43 }
 0x100   :  { %v241_v55 = vpop.f32.mrb[7].mxu0  ;;  %v307_v56 = vmul.f32 0.2, %v228_v46  ;;  %v309_v57 = vmul.f32 0.2, %v232_v47  ;;  %v240_v59 = vadd.f32 %v239_v51, %v2287_v41 }
 0x101   :  { %v310_v58 = vmul.f32 0.2, %v236_v49  ;;  %v2311_v60 = vmax.f32 %v226_v44, %v306_v52  ;;  %v2313_v61 = vmax.f32 %v230_v45, %v308_v53  ;;  %v311_v62 = vmul.f32 0.2, %v238_v54  ;;  %v245_v2 = vpop.f32.mrb[8].mxu0 }
 0x102   :  { %v2315_v63 = vmax.f32 %v228_v46, %v307_v56  ;;  %v2317_v0 = vmax.f32 %v232_v47, %v309_v57  ;;  %v242_v1 = vadd.f32 %v241_v55, %v2290_v43  ;;  %v246_v4 = vadd.f32 %v245_v2, %v2287_v41  ;;  %v247_v5 = vpop.f32.mrb[9].mxu0 }
 0x103   :  { %v2320_v3 = vmax.f32 %v236_v49, %v310_v58  ;;  %v312_v6 = vmul.f32 0.2, %v240_v59  ;;  %v248_v7 = vadd.f32 %v247_v5, %v2290_v43  ;;  %v249_v8 = vpop.f32.mrb[10].mxu0  ;;  %v415_v9 = vmul.f32 %v2311_v60, %v2311_v60 }
 0x104   :  { %v417_v10 = vmul.f32 %v2313_v61, %v2313_v61  ;;  %v2328_v11 = vmax.f32 %v238_v54, %v311_v62  ;;  %v251_v12 = vpop.f32.mrb[11].mxu0  ;;  %v416_v13 = vmul.f32 %v2315_v63, %v2315_v63  ;;  %v370_v14 = vadd.f32 %v2313_v61, %v2311_v60 }
 0x105   :  { %v418_v15 = vmul.f32 %v2317_v0, %v2317_v0  ;;  %v313_v16 = vmul.f32 0.2, %v242_v1  ;;  %v391_v17 = vadd.f32 %v2317_v0, %v2315_v63  ;;  %v419_v18 = vmul.f32 %v2320_v3, %v2320_v3 }
 0x106   :  { %v314_v19 = vmul.f32 0.2, %v246_v4  ;;  %v250_v20 = vadd.f32 %v249_v8, %v2287_v41  ;;  %v371_v21 = vadd.f32 %v370_v14, %v2320_v3  ;;  %v2342_v22 = vmax.f32 %v240_v59, %v312_v6 }
 0x107   :  { %v315_v23 = vmul.f32 0.2, %v248_v7  ;;  %v252_v24 = vadd.f32 %v251_v12, %v2290_v43  ;;  %v447_v25 = vadd.f32 %v417_v10, %v415_v9  ;;  %v420_v26 = vmul.f32 %v2328_v11, %v2328_v11 }
 0x108   :  { %v468_v27 = vadd.f32 %v418_v15, %v416_v13  ;;  %v392_v28 = vadd.f32 %v391_v17, %v2328_v11  ;;  %v2348_v29 = vmax.f32 %v242_v1, %v313_v16  ;;  %v255_v30 = vpop.f32.mrb[12].mxu0  ;;  %v2350_v32 = vmax.f32 %v246_v4, %v314_v19 }
 0x109   :  { %v448_v31 = vadd.f32 %v447_v25, %v419_v18  ;;  %v316_v33 = vmul.f32 0.2, %v250_v20  ;;  %v256_v36 = vadd.f32 %v255_v30, %v2287_v41  ;;  %v257_v37 = vpop.f32.mrb[13].mxu0  ;;  %v372_v39 = vadd.f32 %v371_v21, %v2342_v22 }
 0x10a   :  { %v2354_v40 = vmax.f32 %v248_v7, %v315_v23  ;;  %v317_v42 = vmul.f32 0.2, %v252_v24  ;;  %v258_v44 = vadd.f32 %v257_v37, %v2290_v43  ;;  %v259_v45 = vpop.f32.mrb[14].mxu0  ;;  %v469_v46 = vadd.f32 %v468_v27, %v420_v26 }
 0x10b   :  { %v421_v47 = vmul.f32 %v2342_v22, %v2342_v22  ;;  %v318_v48 = vmul.f32 0.2, %v256_v36  ;;  %v260_v49 = vadd.f32 %v259_v45, %v2287_v41  ;;  %v261_v50 = vpop.f32.mrb[15].mxu0  ;;  %v393_v51 = vadd.f32 %v392_v28, %v2348_v29 }
 0x10c   :  { %v422_v52 = vmul.f32 %v2348_v29, %v2348_v29  ;;  %v319_v53 = vmul.f32 0.2, %v258_v44  ;;  %v262_v54 = vadd.f32 %v261_v50, %v2290_v43  ;;  %v373_v55 = vadd.f32 %v372_v39, %v2350_v32 }
 0x10d   :  { %v423_v56 = vmul.f32 %v2350_v32, %v2350_v32  ;;  %v2367_v57 = vmax.f32 %v250_v20, %v316_v33  ;;  %v394_v58 = vadd.f32 %v393_v51, %v2354_v40  ;;  %v424_v59 = vmul.f32 %v2354_v40, %v2354_v40 }
 0x10e   :  { %v2372_v62 = vmax.f32 %v252_v24, %v317_v42  ;;  %v449_v1 = vadd.f32 %v448_v31, %v421_v47  ;;  %v2374_v2 = vmax.f32 %v256_v36, %v318_v48  ;;  %v320_v4 = vmul.f32 0.2, %v260_v49 }
 0x10f   :  { %v470_v5 = vadd.f32 %v469_v46, %v422_v52  ;;  %v2376_v6 = vmax.f32 %v258_v44, %v319_v53  ;;  %v321_v7 = vmul.f32 0.2, %v262_v54  ;;  %v374_v10 = vadd.f32 %v373_v55, %v2367_v57 }
 0x110   :  { %v265_v8 = vpop.f32.mrb[16].mxu0  ;;  %v450_v9 = vadd.f32 %v449_v1, %v423_v56  ;;  %v425_v12 = vmul.f32 %v2367_v57, %v2367_v57  ;;  %v395_v16 = vadd.f32 %v394_v58, %v2372_v62  ;;  %v426_v17 = vmul.f32 %v2372_v62, %v2372_v62 }
 0x111   :  { %v266_v13 = vadd.f32 %v265_v8, %v2287_v41  ;;  %v267_v14 = vpop.f32.mrb[17].mxu0  ;;  %v471_v15 = vadd.f32 %v470_v5, %v424_v59  ;;  %v427_v20 = vmul.f32 %v2374_v2, %v2374_v2  ;;  %v2388_v21 = vmax.f32 %v260_v49, %v320_v4 }
 0x112   :  { %v268_v18 = vadd.f32 %v267_v14, %v2290_v43  ;;  %v269_v19 = vpop.f32.mrb[18].mxu0  ;;  %v428_v26 = vmul.f32 %v2376_v6, %v2376_v6  ;;  %v2393_v27 = vmax.f32 %v262_v54, %v321_v7  ;;  %v451_v31 = vadd.f32 %v450_v9, %v425_v12 }
 0x113   :  { %v322_v23 = vmul.f32 0.2, %v266_v13  ;;  %v270_v24 = vadd.f32 %v269_v19, %v2287_v41  ;;  %v271_v25 = vpop.f32.mrb[19].mxu0  ;;  %v375_v33 = vadd.f32 %v374_v10, %v2374_v2  ;;  %v472_v39 = vadd.f32 %v471_v15, %v426_v17 }
 0x114   :  { %v323_v28 = vmul.f32 0.2, %v268_v18  ;;  %v272_v30 = vadd.f32 %v271_v25, %v2290_v43  ;;  %v396_v42 = vadd.f32 %v395_v16, %v2376_v6  ;;  %v452_v46 = vadd.f32 %v451_v31, %v427_v20 }
 0x115   :  { %v2397_v36 = vmax.f32 %v266_v13, %v322_v23  ;;  %v324_v37 = vmul.f32 0.2, %v270_v24  ;;  %v429_v47 = vmul.f32 %v2388_v21, %v2388_v21  ;;  %v473_v48 = vadd.f32 %v472_v39, %v428_v26 }
 0x116   :  { %v2400_v44 = vmax.f32 %v268_v18, %v323_v28  ;;  %v325_v45 = vmul.f32 0.2, %v272_v30  ;;  %v430_v49 = vmul.f32 %v2393_v27, %v2393_v27  ;;  %v376_v51 = vadd.f32 %v375_v33, %v2388_v21 }
 0x117   :  { %v431_v52 = vmul.f32 %v2397_v36, %v2397_v36  ;;  %v2409_v53 = vmax.f32 %v270_v24, %v324_v37  ;;  %v397_v56 = vadd.f32 %v396_v42, %v2393_v27  ;;  %v453_v5 = vadd.f32 %v452_v46, %v429_v47 }
 0x118   :  { %v275_v50 = vpop.f32.mrb[20].mxu0  ;;  %v432_v58 = vmul.f32 %v2400_v44, %v2400_v44  ;;  %v2415_v59 = vmax.f32 %v272_v30, %v325_v45  ;;  %v377_v7 = vadd.f32 %v376_v51, %v2397_v36  ;;  %v474_v12 = vadd.f32 %v473_v48, %v430_v49 }
 0x119   :  { %v276_v54 = vadd.f32 %v275_v50, %v2287_v41  ;;  %v277_v55 = vpop.f32.mrb[21].mxu0  ;;  %v398_v13 = vadd.f32 %v397_v56, %v2400_v44  ;;  %v454_v16 = vadd.f32 %v453_v5, %v431_v52  ;;  %v433_v17 = vmul.f32 %v2409_v53, %v2409_v53 }
 0x11a   :  { %v278_v1 = vadd.f32 %v277_v55, %v2290_v43  ;;  %v279_v4 = vpop.f32.mrb[22].mxu0  ;;  %v475_v20 = vadd.f32 %v474_v12, %v432_v58  ;;  %v434_v23 = vmul.f32 %v2415_v59, %v2415_v59  ;;  %v378_v26 = vadd.f32 %v377_v7, %v2409_v53 }
 0x11b   :  { %v326_v8 = vmul.f32 0.2, %v276_v54  ;;  %v280_v9 = vadd.f32 %v279_v4, %v2287_v41  ;;  %v281_v10 = vpop.f32.mrb[23].mxu0  ;;  %v399_v31 = vadd.f32 %v398_v13, %v2415_v59  ;;  %v455_v42 = vadd.f32 %v454_v16, %v433_v17 }
 0x11c   :  { %v327_v14 = vmul.f32 0.2, %v278_v1  ;;  %v282_v15 = vadd.f32 %v281_v10, %v2290_v43  ;;  %v476_v48 = vadd.f32 %v475_v20, %v434_v23 }
 0x11d   :  { %v2424_v18 = vmax.f32 %v276_v54, %v326_v8  ;;  %v328_v19 = vmul.f32 0.2, %v280_v9 }
 0x11e   :  { %v2428_v24 = vmax.f32 %v278_v1, %v327_v14  ;;  %v329_v25 = vmul.f32 0.2, %v282_v15 }
 0x11f   :  { %v435_v28 = vmul.f32 %v2424_v18, %v2424_v18  ;;  %v2433_v30 = vmax.f32 %v280_v9, %v328_v19  ;;  %v379_v45 = vadd.f32 %v378_v26, %v2424_v18 }
 0x120   :  { %v436_v33 = vmul.f32 %v2428_v24, %v2428_v24  ;;  %v2438_v37 = vmax.f32 %v282_v15, %v329_v25  ;;  %v285_v39 = vpop.f32.mrb[24].mxu0  ;;  %v400_v49 = vadd.f32 %v399_v31, %v2428_v24 }
 0x121   :  { %v286_v46 = vadd.f32 %v285_v39, %v2287_v41  ;;  %v287_v47 = vpop.f32.mrb[25].mxu0  ;;  %v456_v52 = vadd.f32 %v455_v42, %v435_v28  ;;  %v437_v54 = vmul.f32 %v2433_v30, %v2433_v30  ;;  %v380_v8 = vadd.f32 %v379_v45, %v2433_v30 }
 0x122   :  { %v288_v50 = vadd.f32 %v287_v47, %v2290_v43  ;;  %v289_v51 = vpop.f32.mrb[26].mxu0  ;;  %v477_v1 = vadd.f32 %v476_v48, %v436_v33  ;;  %v438_v4 = vmul.f32 %v2438_v37, %v2438_v37  ;;  %v401_v12 = vadd.f32 %v400_v49, %v2438_v37 }
 0x123   :  { %v330_v55 = vmul.f32 0.2, %v286_v46  ;;  %v290_v56 = vadd.f32 %v289_v51, %v2287_v41  ;;  %v291_v58 = vpop.f32.mrb[27].mxu0  ;;  %v457_v15 = vadd.f32 %v456_v52, %v437_v54 }
 0x124   :  { %v331_v5 = vmul.f32 0.2, %v288_v50  ;;  %v292_v7 = vadd.f32 %v291_v58, %v2290_v43  ;;  %v478_v20 = vadd.f32 %v477_v1, %v438_v4 }
 0x125   :  { %v2451_v9 = vmax.f32 %v286_v46, %v330_v55  ;;  %v332_v10 = vmul.f32 0.2, %v290_v56 }
 0x126   :  { %v2454_v13 = vmax.f32 %v288_v50, %v331_v5  ;;  %v333_v14 = vmul.f32 0.2, %v292_v7 }
 0x127   :  { %v381_v16 = vadd.f32 %v380_v8, %v2451_v9  ;;  %v439_v17 = vmul.f32 %v2451_v9, %v2451_v9  ;;  %v2459_v19 = vmax.f32 %v290_v56, %v332_v10 }
 0x128   :  { %v402_v23 = vadd.f32 %v401_v12, %v2454_v13  ;;  %v440_v25 = vmul.f32 %v2454_v13, %v2454_v13  ;;  %v2464_v26 = vmax.f32 %v292_v7, %v333_v14  ;;  %v295_v28 = vpop.f32.mrb[28].mxu0 }
 0x129   :  { %v458_v31 = vadd.f32 %v457_v15, %v439_v17  ;;  %v382_v33 = vadd.f32 %v381_v16, %v2459_v19  ;;  %v441_v39 = vmul.f32 %v2459_v19, %v2459_v19  ;;  %v296_v42 = vadd.f32 %v295_v28, %v2287_v41  ;;  %v297_v45 = vpop.f32.mrb[29].mxu0 }
 0x12a   :  { %v479_v46 = vadd.f32 %v478_v20, %v440_v25  ;;  %v403_v47 = vadd.f32 %v402_v23, %v2464_v26  ;;  %v442_v48 = vmul.f32 %v2464_v26, %v2464_v26  ;;  %v298_v49 = vadd.f32 %v297_v45, %v2290_v43  ;;  %v299_v50 = vpop.f32.mrb[30].mxu0 }
 0x12b   :  { %v459_v51 = vadd.f32 %v458_v31, %v441_v39  ;;  %v334_v52 = vmul.f32 0.2, %v296_v42  ;;  %v300_v54 = vadd.f32 %v299_v50, %v2287_v41  ;;  %v301_v55 = vpop.f32.mrb[31].mxu0 }
 0x12c   :  { %v480_v56 = vadd.f32 %v479_v46, %v442_v48  ;;  %v335_v58 = vmul.f32 0.2, %v298_v49  ;;  %v302_v1 = vadd.f32 %v301_v55, %v2290_v43 }
 0x12d   :  { %v2476_v4 = vmax.f32 %v296_v42, %v334_v52  ;;  %v336_v5 = vmul.f32 0.2, %v300_v54 }
 0x12e   :  { %v2478_v7 = vmax.f32 %v298_v49, %v335_v58  ;;  %v337_v8 = vmul.f32 0.2, %v302_v1 }
 0x12f   :  { %v383_v10 = vadd.f32 %v382_v33, %v2476_v4  ;;  %v443_v12 = vmul.f32 %v2476_v4, %v2476_v4  ;;  %v2483_v14 = vmax.f32 %v300_v54, %v336_v5 }
 0x130   :  { %v404_v41 = vadd.f32 %v403_v47, %v2478_v7  ;;  %v444_v15 = vmul.f32 %v2478_v7, %v2478_v7  ;;  %v2488_v16 = vmax.f32 %v302_v1, %v337_v8 }
 0x131   :  { %v460_v43 = vadd.f32 %v459_v51, %v443_v12  ;;  %v384_v17 = vadd.f32 %v383_v10, %v2483_v14  ;;  %v445_v20 = vmul.f32 %v2483_v14, %v2483_v14 }
 0x132   :  { %v481_v23 = vadd.f32 %v480_v56, %v444_v15  ;;  %v405_v25 = vadd.f32 %v404_v41, %v2488_v16  ;;  %v446_v28 = vmul.f32 %v2488_v16, %v2488_v16 }
 0x133   :  { %v385_v31 = vrot.slane %v384_v17, 4  ;;  %v461_v33 = vadd.f32 %v460_v43, %v445_v20 }
 0x134   :  { %v406_v39 = vrot.slane %v405_v25, 4  ;;  %v482_v42 = vadd.f32 %v481_v23, %v446_v28 }
 0x135   :  { %v386_v45 = vadd.f32 %v385_v31, %v384_v17  ;;  %v462_v46 = vrot.slane %v461_v33, 4 }
 0x136   :  { %v407_v47 = vadd.f32 %v406_v39, %v405_v25  ;;  %v483_v48 = vrot.slane %v482_v42, 4 }
 0x137   :  { %v387_v49 = vrot.slane %v386_v45, 2  ;;  %v463_v50 = vadd.f32 %v462_v46, %v461_v33 }
 0x138   :  { %v408_v51 = vrot.slane %v407_v47, 2  ;;  %v484_v52 = vadd.f32 %v483_v48, %v482_v42 }
 0x139   :  { %v388_v54 = vadd.f32 %v387_v49, %v386_v45  ;;  %v464_v55 = vrot.slane %v463_v50, 2 }
 0x13a   :  { %v409_v56 = vadd.f32 %v408_v51, %v407_v47  ;;  %v485_v58 = vrot.slane %v484_v52, 2 }
 0x13b   :  { %v389_v1 = vrot.slane %v388_v54, 1  ;;  %v465_v5 = vadd.f32 %v464_v55, %v463_v50  ;;  %v2123_v50 = vmov 1966171168  }
 0x13c   :  { %v410_v8 = vrot.slane %v409_v56, 1  ;;  %v486_v10 = vadd.f32 %v485_v58, %v484_v52  ;;  %v505_v51 = vunpack.c.l.s4 %v2123_v50 }
 0x13d   :  { %v390_v12 = vadd.f32 %v389_v1, %v388_v54  ;;  %v466_v41 = vrot.slane %v465_v5, 1 }
 0x13e   :  { %v411_v15 = vadd.f32 %v410_v8, %v409_v56  ;;  %v487_v43 = vrot.slane %v486_v10, 1  ;;  %v506_v52 = vunpack.c.0.s8 %v505_v51 }
 0x13f   :  { %v413_v17 = vmul.f32 0.0078125, %v390_v12  ;;  %v467_v20 = vadd.f32 %v466_v41, %v465_v5  ;;  %v304_v5 = vld [vmem:[%s3835_s3] sm:$0x3] }
 0x140   :  { %v414_v23 = vmul.f32 0.0078125, %v411_v15  ;;  %v488_v25 = vadd.f32 %v487_v43, %v486_v10  ;;  %v2497_v55 = vsub.s32 %v506_v52, %v2275_v34 }
 0x141   :  { %v489_v28 = vmul.f32 0.0078125, %v467_v20  ;;  %v491_v31 = vmul.f32 %v413_v17, %v413_v17 }
 0x142   :  { %v490_v33 = vmul.f32 0.0078125, %v488_v25  ;;  %v492_v39 = vmul.f32 %v414_v23, %v414_v23 }
 0x143   :  { %v493_v42 = vsub.f32 %v489_v28, %v491_v31 }
 0x144   :  { %v494_v45 = vsub.f32 %v490_v33, %v492_v39 }
 0x145   :  { %v495_v46 = vmax.f32 %v493_v42, 0.0 }
 0x146   :  { %v496_v47 = vmax.f32 %v494_v45, 0.0 }
 0x147   :  { %v497_v48 = vadd.f32 1e-05, %v495_v46 }
 0x148   :  { %v498_v49 = vadd.f32 1e-05, %v496_v47 }
 0x149   :  { %2074 = vrsqrt.f32 %v497_v48 }
 0x14a   :  { %2076 = vrsqrt.f32 %v498_v49 }
 0x153   :  { %v2075_v54 = vpop.eup %2074 }
 0x154   :  { %v2077_v56 = vpop.eup %2076 }
 0x155   :  { %v503_v58 = vcombine.low %v2075_v54, %v2077_v56 }
 0x157   :  { %v510_v1 = vrot.slane %v503_v58, %v2497_v55 }
 0x159   :  { %v517_v8 = vrot.slane %v510_v1, %v2497_v55 }
 0x15b   :  { %v519_v10 = vmul.f32 %v517_v8, %v304_v5 }
 0x15d   :  { %v524_v12 = vrot.slane %v519_v10, %v2278_v35  ;;  %v528_v41 = vrot.slane %v519_v10, %v2284_v38 }
 0x15f   :  { %v531_v15 = vmul.f32 %v524_v12, %v413_v17  ;;  %v532_v43 = vmul.f32 %v528_v41, %v414_v23  ;;  %v552_v25 = vmul.f32 %v524_v12, %v2311_v60  ;;  %v553_v28 = vmul.f32 %v528_v41, %v2315_v63  ;;  %v305_v60 = vld [vmem:[%s3836_s4] sm:$0x3] }
 0x160   :  { %v554_v31 = vmul.f32 %v524_v12, %v2313_v61  ;;  %v555_v33 = vmul.f32 %v528_v41, %v2317_v0  ;;  %v556_v39 = vmul.f32 %v524_v12, %v2320_v3  ;;  %v557_v45 = vmul.f32 %v528_v41, %v2328_v11 }
 0x161   :  { %v535_v20 = vcombine.low %v531_v15, %v532_v43  ;;  %v558_v46 = vmul.f32 %v524_v12, %v2342_v22  ;;  %v559_v17 = vmul.f32 %v528_v41, %v2348_v29  ;;  %v560_v63 = vmul.f32 %v524_v12, %v2350_v32 }
 0x162   :  { %v561_v61 = vmul.f32 %v528_v41, %v2354_v40  ;;  %v562_v0 = vmul.f32 %v524_v12, %v2367_v57  ;;  %v563_v3 = vmul.f32 %v528_v41, %v2372_v62  ;;  %v564_v11 = vmul.f32 %v524_v12, %v2374_v2 }
 0x163   :  { %v542_v42 = vrot.slane %v535_v20, %v2497_v55  ;;  %v565_v22 = vmul.f32 %v528_v41, %v2376_v6  ;;  %v574_v29 = vmul.f32 %v524_v12, %v2433_v30  ;;  %v575_v47 = vmul.f32 %v528_v41, %v2438_v37 }
 0x164   :  { %v576_v48 = vmul.f32 %v524_v12, %v2451_v9  ;;  %v577_v32 = vmul.f32 %v528_v41, %v2454_v13  ;;  %v578_v40 = vmul.f32 %v524_v12, %v2459_v19  ;;  %v579_v57 = vmul.f32 %v528_v41, %v2464_v26 }
 0x165   :  { %v549_v23 = vrot.slane %v542_v42, %v2497_v55  ;;  %v580_v62 = vmul.f32 %v524_v12, %v2476_v4  ;;  %v581_v50 = vmul.f32 %v528_v41, %v2478_v7  ;;  %v566_v2 = vmul.f32 %v524_v12, %v2388_v21 }
 0x166   :  { %v567_v6 = vmul.f32 %v528_v41, %v2393_v27  ;;  %v582_v30 = vmul.f32 %v524_v12, %v2483_v14  ;;  %v583_v37 = vmul.f32 %v528_v41, %v2488_v16  ;;  %v568_v9 = vmul.f32 %v524_v12, %v2397_v36 }
 0x167   :  { %v551_v49 = vsub.f32 %v305_v60, %v549_v23  ;;  %v569_v13 = vmul.f32 %v528_v41, %v2400_v44  ;;  %v570_v4 = vmul.f32 %v524_v12, %v2409_v53  ;;  %v571_v7 = vmul.f32 %v528_v41, %v2415_v59 }
 0x168   :  { %v572_v21 = vmul.f32 %v524_v12, %v2424_v18  ;;  %v573_v27 = vmul.f32 %v528_v41, %v2428_v24 }
 0x169   :  { %v588_v19 = vrot.slane %v551_v49, %v2278_v35  ;;  %v592_v26 = vrot.slane %v551_v49, %v2284_v38 }
 0x16b   :  { %v2545_v51 = vadd.f32 %v588_v19, %v552_v25  ;;  %v596_v14 = vadd.f32 %v592_v26, %v553_v28  ;;  %v2547_v16 = vadd.f32 %v588_v19, %v554_v31  ;;  %v598_v36 = vadd.f32 %v592_v26, %v555_v33 }
 0x16c   :  { %v2549_v52 = vadd.f32 %v588_v19, %v556_v39  ;;  %v2551_v44 = vadd.f32 %v592_v26, %v557_v45  ;;  %v2553_v54 = vadd.f32 %v588_v19, %v558_v46  ;;  %v2555_v56 = vadd.f32 %v592_v26, %v559_v17 }
 0x16d   :  { %v2557_v53 = vadd.f32 %v588_v19, %v560_v63  ;;  %v2559_v59 = vadd.f32 %v592_v26, %v561_v61  ;;  %v2561_v18 = vadd.f32 %v588_v19, %v562_v0  ;;  %v2563_v24 = vadd.f32 %v592_v26, %v563_v3 }
 0x16e   :  { %v2565_v58 = vadd.f32 %v588_v19, %v564_v11  ;;  %v2567_v1 = vadd.f32 %v592_v26, %v565_v22  ;;  %v2569_v5 = vadd.f32 %v588_v19, %v566_v2  ;;  %v2571_v8 = vadd.f32 %v592_v26, %v567_v6 }
 0x16f   :  { %v2573_v10 = vadd.f32 %v588_v19, %v568_v9  ;;  %v2575_v12 = vadd.f32 %v592_v26, %v569_v13  ;;  %v2577_v41 = vadd.f32 %v588_v19, %v570_v4  ;;  %v2579_v15 = vadd.f32 %v592_v26, %v571_v7 }
 0x170   :  { %v2581_v43 = vadd.f32 %v588_v19, %v572_v21  ;;  %v2583_v20 = vadd.f32 %v592_v26, %v573_v27  ;;  %v2585_v25 = vadd.f32 %v588_v19, %v574_v29  ;;  %v2587_v28 = vadd.f32 %v592_v26, %v575_v47 }
 0x171   :  { %v2589_v31 = vadd.f32 %v588_v19, %v576_v48  ;;  %v2591_v33 = vadd.f32 %v592_v26, %v577_v32  ;;  %v2593_v39 = vadd.f32 %v588_v19, %v578_v40  ;;  %v2595_v42 = vadd.f32 %v592_v26, %v579_v57 }
 0x172   :  { %v2597_v45 = vadd.f32 %v588_v19, %v580_v62  ;;  %v2599_v46 = vadd.f32 %v592_v26, %v581_v50  ;;  %v2601_v17 = vadd.f32 %v588_v19, %v582_v30  ;;  %v2603_v60 = vadd.f32 %v592_v26, %v583_v37 }
 0x173   :  { %2108 = dma.done.wait [#allocation4], 8192 }
 0x174   :  { %2109 = vsyncadd [#allocation4], 4294959104  ;;  %v632_v63 = vpack.c.bf16 %v598_v36, %v596_v14  ;;  %v648_v61 = vld [vmem:[#allocation2 + $0x8] sm:$0xff]  ;;  %v650_v0 = vld [vmem:[#allocation2 + $0x18] sm:$0xff] }
 0x175   :  { %v647_v3 = vld [vmem:[#allocation2] sm:$0xff]  ;;  %733 = vmatprep.subr.bf16.mxu1 %v648_v61  ;;  %846 = vmatprep.subr.bf16.mxu0 %v650_v0  ;;  %v649_v23 = vld [vmem:[#allocation2 + $0x10] sm:$0xff]  ;;  %v652_v11 = vld [vmem:[#allocation2 + $0x28] sm:$0xff] }
 0x176   :  { %765 = vmatprep.mubr.bf16.mxu1 %v632_v63  ;;  %878 = vmatprep.mubr.bf16.mxu0 %v632_v63  ;;  %v654_v22 = vld [vmem:[#allocation2 + $0x38] sm:$0xff]  ;;  %v651_v29 = vld [vmem:[#allocation2 + $0x20] sm:$0xff]  ;;  %v653_v47 = vld [vmem:[#allocation2 + $0x30] sm:$0xff] }
 0x177   :  { %734 = vmatpush1.bf16.msra.mxu1 %v647_v3  ;;  %847 = vmatpush1.bf16.msra.mxu0 %v649_v23  ;;  %v656_v48 = vld [vmem:[#allocation2 + $0x48] sm:$0xff]  ;;  %v658_v32 = vld [vmem:[#allocation2 + $0x58] sm:$0xff]  ;;  %v655_v40 = vld [vmem:[#allocation2 + $0x40] sm:$0xff] }
 0x178   :  { %735 = vmatprep.subr.bf16.mxu1 %v652_v11  ;;  %848 = vmatprep.subr.bf16.mxu0 %v654_v22  ;;  %v657_v49 = vld [vmem:[#allocation2 + $0x50] sm:$0xff]  ;;  %v660_v57 = vld [vmem:[#allocation2 + $0x68] sm:$0xff]  ;;  %v662_v62 = vld [vmem:[#allocation2 + $0x78] sm:$0xff] }
 0x179   :  { %v659_v50 = vld [vmem:[#allocation2 + $0x60] sm:$0xff]  ;;  %v661_v2 = vld [vmem:[#allocation2 + $0x70] sm:$0xff]  ;;  %v664_v6 = vld [vmem:[#allocation2 + $0x88] sm:$0xff] }
 0x17a   :  { %v666_v30 = vld [vmem:[#allocation2 + $0x98] sm:$0xff]  ;;  %v663_v37 = vld [vmem:[#allocation2 + $0x80] sm:$0xff]  ;;  %v665_v9 = vld [vmem:[#allocation2 + $0x90] sm:$0xff] }
 0x17b   :  { %736 = vmatpush1.bf16.msra.mxu1 %v651_v29  ;;  %849 = vmatpush1.bf16.msra.mxu0 %v653_v47  ;;  %v668_v13 = vld [vmem:[#allocation2 + $0xa8] sm:$0xff]  ;;  %v670_v19 = vld [vmem:[#allocation2 + $0xb8] sm:$0xff]  ;;  %v667_v26 = vld [vmem:[#allocation2 + $0xa0] sm:$0xff] }
 0x17c   :  { %737 = vmatprep.subr.bf16.mxu1 %v656_v48  ;;  %850 = vmatprep.subr.bf16.mxu0 %v658_v32  ;;  %v669_v4 = vld [vmem:[#allocation2 + $0xb0] sm:$0xff]  ;;  %v672_v7 = vld [vmem:[#allocation2 + $0xc8] sm:$0xff]  ;;  %v674_v21 = vld [vmem:[#allocation2 + $0xd8] sm:$0xff] }
 0x17d   :  { %v671_v27 = vld [vmem:[#allocation2 + $0xc0] sm:$0xff]  ;;  %v673_v14 = vld [vmem:[#allocation2 + $0xd0] sm:$0xff]  ;;  %v676_v36 = vld [vmem:[#allocation2 + $0xe8] sm:$0xff] }
 0x17e   :  { %v678_v63 = vld [vmem:[#allocation2 + $0xf8] sm:$0xff]  ;;  %v675_v61 = vld [vmem:[#allocation2 + $0xe0] sm:$0xff]  ;;  %v677_v0 = vld [vmem:[#allocation2 + $0xf0] sm:$0xff] }
 0x17f   :  { %738 = vmatpush1.bf16.msra.mxu1 %v655_v40  ;;  %851 = vmatpush1.bf16.msra.mxu0 %v657_v49  ;;  %v680_v3 = vld [vmem:[#allocation2 + $0x108] sm:$0xff]  ;;  %v682_v23 = vld [vmem:[#allocation2 + $0x118] sm:$0xff]  ;;  %v679_v11 = vld [vmem:[#allocation2 + $0x100] sm:$0xff] }
 0x180   :  { %739 = vmatprep.subr.bf16.mxu1 %v660_v57  ;;  %852 = vmatprep.subr.bf16.mxu0 %v662_v62  ;;  %v681_v22 = vld [vmem:[#allocation2 + $0x110] sm:$0xff]  ;;  %v684_v29 = vld [vmem:[#allocation2 + $0x128] sm:$0xff]  ;;  %v686_v47 = vld [vmem:[#allocation2 + $0x138] sm:$0xff] }
 0x181   :  { %v683_v48 = vld [vmem:[#allocation2 + $0x120] sm:$0xff]  ;;  %v685_v32 = vld [vmem:[#allocation2 + $0x130] sm:$0xff]  ;;  %v688_v40 = vld [vmem:[#allocation2 + $0x148] sm:$0xff] }
 0x182   :  { %v690_v49 = vld [vmem:[#allocation2 + $0x158] sm:$0xff]  ;;  %v687_v57 = vld [vmem:[#allocation2 + $0x140] sm:$0xff]  ;;  %v689_v62 = vld [vmem:[#allocation2 + $0x150] sm:$0xff] }
 0x183   :  { %740 = vmatpush1.bf16.msra.mxu1 %v659_v50  ;;  %853 = vmatpush1.bf16.msra.mxu0 %v661_v2  ;;  %v692_v50 = vld [vmem:[#allocation2 + $0x168] sm:$0xff]  ;;  %v694_v2 = vld [vmem:[#allocation2 + $0x178] sm:$0xff] }
 0x184   :  { %741 = vmatprep.subr.bf16.mxu1 %v664_v6  ;;  %854 = vmatprep.subr.bf16.mxu0 %v666_v30  ;;  %v691_v6 = vld [vmem:[#allocation2 + $0x160] sm:$0xff]  ;;  %v693_v30 = vld [vmem:[#allocation2 + $0x170] sm:$0xff] }
 0x187   :  { %742 = vmatpush1.bf16.msra.mxu1 %v663_v37  ;;  %855 = vmatpush1.bf16.msra.mxu0 %v665_v9  ;;  %v696_v37 = vld [vmem:[#allocation2 + $0x188] sm:$0xff]  ;;  %v698_v9 = vld [vmem:[#allocation2 + $0x198] sm:$0xff] }
 0x188   :  { %743 = vmatprep.subr.bf16.mxu1 %v668_v13  ;;  %856 = vmatprep.subr.bf16.mxu0 %v670_v19  ;;  %v695_v13 = vld [vmem:[#allocation2 + $0x180] sm:$0xff]  ;;  %v697_v19 = vld [vmem:[#allocation2 + $0x190] sm:$0xff] }
 0x18b   :  { %744 = vmatpush1.bf16.msra.mxu1 %v667_v26  ;;  %857 = vmatpush1.bf16.msra.mxu0 %v669_v4  ;;  %v700_v26 = vld [vmem:[#allocation2 + $0x1a8] sm:$0xff]  ;;  %v702_v4 = vld [vmem:[#allocation2 + $0x1b8] sm:$0xff] }
 0x18c   :  { %745 = vmatprep.subr.bf16.mxu1 %v672_v7  ;;  %858 = vmatprep.subr.bf16.mxu0 %v674_v21  ;;  %v699_v7 = vld [vmem:[#allocation2 + $0x1a0] sm:$0xff]  ;;  %v701_v21 = vld [vmem:[#allocation2 + $0x1b0] sm:$0xff] }
 0x18f   :  { %746 = vmatpush1.bf16.msra.mxu1 %v671_v27  ;;  %859 = vmatpush1.bf16.msra.mxu0 %v673_v14  ;;  %v704_v27 = vld [vmem:[#allocation2 + $0x1c8] sm:$0xff]  ;;  %v706_v14 = vld [vmem:[#allocation2 + $0x1d8] sm:$0xff] }
 0x190   :  { %747 = vmatprep.subr.bf16.mxu1 %v676_v36  ;;  %860 = vmatprep.subr.bf16.mxu0 %v678_v63  ;;  %v703_v36 = vld [vmem:[#allocation2 + $0x1c0] sm:$0xff]  ;;  %v705_v63 = vld [vmem:[#allocation2 + $0x1d0] sm:$0xff] }
 0x193   :  { %748 = vmatpush1.bf16.msra.mxu1 %v675_v61  ;;  %861 = vmatpush1.bf16.msra.mxu0 %v677_v0  ;;  %v708_v61 = vld [vmem:[#allocation2 + $0x1e8] sm:$0xff]  ;;  %v710_v0 = vld [vmem:[#allocation2 + $0x1f8] sm:$0xff] }
 0x194   :  { %749 = vmatprep.subr.bf16.mxu1 %v680_v3  ;;  %862 = vmatprep.subr.bf16.mxu0 %v682_v23  ;;  %v707_v3 = vld [vmem:[#allocation2 + $0x1e0] sm:$0xff]  ;;  %v709_v23 = vld [vmem:[#allocation2 + $0x1f0] sm:$0xff] }
 0x197   :  { %750 = vmatpush1.bf16.msra.mxu1 %v679_v11  ;;  %863 = vmatpush1.bf16.msra.mxu0 %v681_v22  ;;  %v631_v11 = vpack.c.bf16 %v2547_v16, %v2545_v51  ;;  %v634_v22 = vpack.c.bf16 %v2555_v56, %v2551_v44  ;;  %v635_v51 = vpack.c.bf16 %v2561_v18, %v2557_v53 }
 0x198   :  { %751 = vmatprep.subr.bf16.mxu1 %v684_v29  ;;  %864 = vmatprep.subr.bf16.mxu0 %v686_v47  ;;  %v633_v29 = vpack.c.bf16 %v2553_v54, %v2549_v52  ;;  %v636_v47 = vpack.c.bf16 %v2563_v24, %v2559_v59  ;;  %v638_v16 = vpack.c.bf16 %v2571_v8, %v2567_v1  ;;  %v2636_v1 = vsub.s32 2, %v2275_v34 }
 0x199   :  { %v637_v52 = vpack.c.bf16 %v2569_v5, %v2565_v58  ;;  %v640_v44 = vpack.c.bf16 %v2579_v15, %v2575_v12  ;;  %v639_v54 = vpack.c.bf16 %v2577_v41, %v2573_v10  ;;  %v642_v56 = vpack.c.bf16 %v2587_v28, %v2583_v20  ;;  %v711_v5 = vld [vmem:[%s3838_s6] sm:$0xf] }
 0x19a   :  { %v641_v53 = vpack.c.bf16 %v2585_v25, %v2581_v43  ;;  %v644_v59 = vpack.c.bf16 %v2595_v42, %v2591_v33  ;;  %v643_v18 = vpack.c.bf16 %v2593_v39, %v2589_v31  ;;  %v646_v24 = vpack.c.bf16 %v2603_v60, %v2599_v46 }
 0x19b   :  { %752 = vmatpush1.bf16.msra.mxu1 %v683_v48  ;;  %865 = vmatpush1.bf16.msra.mxu0 %v685_v32  ;;  %v645_v58 = vpack.c.bf16 %v2601_v17, %v2597_v45  ;;  %v2642_v8 = vsub.s32 3, %v2275_v34  ;;  %v2645_v10 = vrot.slane %v711_v5, %v2278_v35  ;;  %v2648_v12 = vrot.slane %v711_v5, %v2636_v1 }
 0x19c   :  { %753 = vmatprep.subr.bf16.mxu1 %v688_v40  ;;  %866 = vmatprep.subr.bf16.mxu0 %v690_v49  ;;  %v2651_v41 = vrot.slane %v711_v5, %v2284_v38 }
 0x19d   :  { %v2654_v15 = vrot.slane %v711_v5, %v2642_v8 }
 0x19f   :  { %754 = vmatpush1.bf16.msra.mxu1 %v687_v57  ;;  %867 = vmatpush1.bf16.msra.mxu0 %v689_v62 }
 0x1a0   :  { %755 = vmatprep.subr.bf16.mxu1 %v692_v50  ;;  %868 = vmatprep.subr.bf16.mxu0 %v694_v2 }
 0x1a3   :  { %756 = vmatpush1.bf16.msra.mxu1 %v691_v6  ;;  %869 = vmatpush1.bf16.msra.mxu0 %v693_v30 }
 0x1a4   :  { %757 = vmatprep.subr.bf16.mxu1 %v696_v37  ;;  %870 = vmatprep.subr.bf16.mxu0 %v698_v9 }
 0x1a7   :  { %758 = vmatpush1.bf16.msra.mxu1 %v695_v13  ;;  %871 = vmatpush1.bf16.msra.mxu0 %v697_v19 }
 0x1a8   :  { %759 = vmatprep.subr.bf16.mxu1 %v700_v26  ;;  %872 = vmatprep.subr.bf16.mxu0 %v702_v4 }
 0x1ab   :  { %760 = vmatpush1.bf16.msra.mxu1 %v699_v7  ;;  %873 = vmatpush1.bf16.msra.mxu0 %v701_v21 }
 0x1ac   :  { %761 = vmatprep.subr.bf16.mxu1 %v704_v27  ;;  %874 = vmatprep.subr.bf16.mxu0 %v706_v14 }
 0x1af   :  { %762 = vmatpush1.bf16.msra.mxu1 %v703_v36  ;;  %875 = vmatpush1.bf16.msra.mxu0 %v705_v63 }
 0x1b0   :  { %763 = vmatprep.subr.bf16.mxu1 %v708_v61  ;;  %876 = vmatprep.subr.bf16.mxu0 %v710_v0 }
 0x1b3   :  { %764 = vmatpush1.bf16.msra.mxu1 %v707_v3  ;;  %877 = vmatpush1.bf16.msra.mxu0 %v709_v23 }
 0x1b6   :  { %766 = vmatmul.mubr.bf16.vlgmr.msra.gmra.mrb[0].mxu1 %v631_v11  ;;  %879 = vmatmul.mubr.bf16.vlgmr.msra.gmra.mrb[32].mxu0 %v631_v11 }
 0x1b7   :  { %775 = vmatprep.mubr.bf16.mxu1 %v634_v22  ;;  %888 = vmatprep.mubr.bf16.mxu0 %v634_v22 }
 0x1be   :  { %776 = vmatmul.mubr.bf16.gmra.mrb[4].mxu1 %v633_v29  ;;  %889 = vmatmul.mubr.bf16.gmra.mrb[36].mxu0 %v633_v29 }
 0x1bf   :  { %785 = vmatprep.mubr.bf16.mxu1 %v636_v47  ;;  %898 = vmatprep.mubr.bf16.mxu0 %v636_v47 }
 0x1c6   :  { %786 = vmatmul.mubr.bf16.gmra.mrb[8].mxu1 %v635_v51  ;;  %899 = vmatmul.mubr.bf16.gmra.mrb[40].mxu0 %v635_v51 }
 0x1c7   :  { %795 = vmatprep.mubr.bf16.mxu1 %v638_v16  ;;  %908 = vmatprep.mubr.bf16.mxu0 %v638_v16 }
 0x1ce   :  { %796 = vmatmul.mubr.bf16.gmra.mrb[12].mxu1 %v637_v52  ;;  %909 = vmatmul.mubr.bf16.gmra.mrb[44].mxu0 %v637_v52 }
 0x1cf   :  { %805 = vmatprep.mubr.bf16.mxu1 %v640_v44  ;;  %918 = vmatprep.mubr.bf16.mxu0 %v640_v44 }
 0x1d6   :  { %806 = vmatmul.mubr.bf16.gmra.mrb[16].mxu1 %v639_v54  ;;  %919 = vmatmul.mubr.bf16.gmra.mrb[48].mxu0 %v639_v54 }
 0x1d7   :  { %815 = vmatprep.mubr.bf16.mxu1 %v642_v56  ;;  %928 = vmatprep.mubr.bf16.mxu0 %v642_v56 }
 0x1de   :  { %816 = vmatmul.mubr.bf16.gmra.mrb[20].mxu1 %v641_v53  ;;  %929 = vmatmul.mubr.bf16.gmra.mrb[52].mxu0 %v641_v53 }
 0x1df   :  { %825 = vmatprep.mubr.bf16.mxu1 %v644_v59  ;;  %938 = vmatprep.mubr.bf16.mxu0 %v644_v59 }
 0x1e6   :  { %826 = vmatmul.mubr.bf16.gmra.mrb[24].mxu1 %v643_v18  ;;  %939 = vmatmul.mubr.bf16.gmra.mrb[56].mxu0 %v643_v18 }
 0x1e7   :  { %835 = vmatprep.mubr.bf16.mxu1 %v646_v24  ;;  %948 = vmatprep.mubr.bf16.mxu0 %v646_v24 }
 0x1ee   :  { %836 = vmatmul.mubr.bf16.gmra.mrb[28].mxu1 %v645_v58  ;;  %949 = vmatmul.mubr.bf16.gmra.mrb[60].mxu0 %v645_v58 }
 0x289   :  { %v767_v43 = vpop.f32.mrb[0].mxu1  ;;  %v880_v20 = vpop.f32.mrb[32].mxu0 }
 0x28a   :  { %v768_v25 = vadd.f32 %v767_v43, %v2645_v10  ;;  %v881_v28 = vadd.f32 %v880_v20, %v2648_v12  ;;  %v769_v34 = vpop.f32.mrb[1].mxu1  ;;  %v882_v31 = vpop.f32.mrb[33].mxu0 }
 0x28b   :  { %v770_v33 = vadd.f32 %v769_v34, %v2651_v41  ;;  %v883_v39 = vadd.f32 %v882_v31, %v2654_v15  ;;  %v771_v42 = vpop.f32.mrb[2].mxu1  ;;  %v884_v45 = vpop.f32.mrb[34].mxu0 }
 0x28c   :  { %v961_v46 = vmul.f32 0.2, %v768_v25  ;;  %v963_v17 = vmul.f32 0.2, %v881_v28  ;;  %v772_v60 = vadd.f32 %v771_v42, %v2645_v10  ;;  %v885_v48 = vadd.f32 %v884_v45, %v2648_v12  ;;  %v773_v32 = vpop.f32.mrb[3].mxu1  ;;  %v886_v40 = vpop.f32.mrb[35].mxu0 }
 0x28d   :  { %v962_v49 = vmul.f32 0.2, %v770_v33  ;;  %v964_v57 = vmul.f32 0.2, %v883_v39  ;;  %v774_v62 = vadd.f32 %v773_v32, %v2651_v41  ;;  %v887_v50 = vadd.f32 %v886_v40, %v2654_v15 }
 0x28e   :  { %v2664_v2 = vmax.f32 %v768_v25, %v961_v46  ;;  %v2666_v6 = vmax.f32 %v881_v28, %v963_v17  ;;  %v965_v30 = vmul.f32 0.2, %v772_v60  ;;  %v967_v37 = vmul.f32 0.2, %v885_v48 }
 0x28f   :  { %v2668_v9 = vmax.f32 %v770_v33, %v962_v49  ;;  %v2670_v13 = vmax.f32 %v883_v39, %v964_v57  ;;  %v966_v19 = vmul.f32 0.2, %v774_v62  ;;  %v968_v26 = vmul.f32 0.2, %v887_v50 }
 0x290   :  { %v1177_v4 = vmul.f32 %v2664_v2, %v2664_v2  ;;  %v1179_v7 = vmul.f32 %v2666_v6, %v2666_v6  ;;  %v2676_v21 = vmax.f32 %v772_v60, %v965_v30  ;;  %v2678_v27 = vmax.f32 %v885_v48, %v967_v37 }
 0x291   :  { %v1178_v14 = vmul.f32 %v2668_v9, %v2668_v9  ;;  %v1180_v36 = vmul.f32 %v2670_v13, %v2670_v13  ;;  %v2684_v63 = vmax.f32 %v774_v62, %v966_v19  ;;  %v2686_v61 = vmax.f32 %v887_v50, %v968_v26  ;;  %v777_v0 = vpop.f32.mrb[4].mxu1  ;;  %v890_v3 = vpop.f32.mrb[36].mxu0 }
 0x292   :  { %v1089_v23 = vadd.f32 %v2676_v21, %v2664_v2  ;;  %v1181_v11 = vmul.f32 %v2676_v21, %v2676_v21  ;;  %v1131_v22 = vadd.f32 %v2678_v27, %v2666_v6  ;;  %v1183_v29 = vmul.f32 %v2678_v27, %v2678_v27  ;;  %v779_v47 = vpop.f32.mrb[5].mxu1  ;;  %v892_v51 = vpop.f32.mrb[37].mxu0 }
 0x293   :  { %3882 = vst [vmem:[#allocation13_spill] sm:$0xff] %v2686_v61  ;;  %v1110_v16 = vadd.f32 %v2684_v63, %v2668_v9  ;;  %v1182_v52 = vmul.f32 %v2684_v63, %v2684_v63  ;;  %v1152_v44 = vadd.f32 %v2686_v61, %v2670_v13  ;;  %v1184_v54 = vmul.f32 %v2686_v61, %v2686_v61  ;;  %v781_v56 = vpop.f32.mrb[6].mxu1  ;;  %v894_v53 = vpop.f32.mrb[38].mxu0 }
 0x294   :  { %v1241_v59 = vadd.f32 %v1181_v11, %v1177_v4  ;;  %v1283_v18 = vadd.f32 %v1183_v29, %v1179_v7  ;;  %v778_v24 = vadd.f32 %v777_v0, %v2645_v10  ;;  %v891_v58 = vadd.f32 %v890_v3, %v2648_v12  ;;  %v783_v5 = vpop.f32.mrb[7].mxu1  ;;  %v896_v43 = vpop.f32.mrb[39].mxu0 }
 0x295   :  { %v1262_v20 = vadd.f32 %v1182_v52, %v1178_v14  ;;  %v1304_v25 = vadd.f32 %v1184_v54, %v1180_v36  ;;  %v780_v28 = vadd.f32 %v779_v47, %v2651_v41  ;;  %v893_v34 = vadd.f32 %v892_v51, %v2654_v15 }
 0x296   :  { %v969_v31 = vmul.f32 0.2, %v778_v24  ;;  %v971_v33 = vmul.f32 0.2, %v891_v58  ;;  %v782_v39 = vadd.f32 %v781_v56, %v2645_v10  ;;  %v895_v42 = vadd.f32 %v894_v53, %v2648_v12 }
 0x297   :  { %v970_v45 = vmul.f32 0.2, %v780_v28  ;;  %v972_v46 = vmul.f32 0.2, %v893_v34  ;;  %v784_v17 = vadd.f32 %v783_v5, %v2651_v41  ;;  %v897_v60 = vadd.f32 %v896_v43, %v2654_v15 }
 0x298   :  { %v2712_v48 = vmax.f32 %v778_v24, %v969_v31  ;;  %v2714_v32 = vmax.f32 %v891_v58, %v971_v33  ;;  %v973_v40 = vmul.f32 0.2, %v782_v39  ;;  %v975_v49 = vmul.f32 0.2, %v895_v42 }
 0x299   :  { %v2716_v57 = vmax.f32 %v780_v28, %v970_v45  ;;  %v2718_v62 = vmax.f32 %v893_v34, %v972_v46  ;;  %v974_v50 = vmul.f32 0.2, %v784_v17  ;;  %v976_v30 = vmul.f32 0.2, %v897_v60  ;;  %v787_v37 = vpop.f32.mrb[8].mxu1  ;;  %v900_v19 = vpop.f32.mrb[40].mxu0 }
 0x29a   :  { %3883 = vst [vmem:[#allocation14_spill] sm:$0xff] %v2712_v48  ;;  %3884 = vst [vmem:[#allocation15_spill] sm:$0xff] %v2714_v32  ;;  %v1090_v26 = vadd.f32 %v1089_v23, %v2712_v48  ;;  %v1185_v4 = vmul.f32 %v2712_v48, %v2712_v48  ;;  %v1132_v7 = vadd.f32 %v1131_v22, %v2714_v32  ;;  %v789_v36 = vpop.f32.mrb[9].mxu1  ;;  %v902_v0 = vpop.f32.mrb[41].mxu0 }
 0x29b   :  { %3885 = vst [vmem:[#allocation16_spill] sm:$0xff] %v2716_v57  ;;  %3886 = vst [vmem:[#allocation17_spill] sm:$0xff] %v2718_v62  ;;  %v1187_v14 = vmul.f32 %v2714_v32, %v2714_v32  ;;  %v1111_v3 = vadd.f32 %v1110_v16, %v2716_v57  ;;  %v1186_v11 = vmul.f32 %v2716_v57, %v2716_v57  ;;  %v791_v47 = vpop.f32.mrb[10].mxu1  ;;  %v904_v51 = vpop.f32.mrb[42].mxu0 }
 0x29c   :  { %v1153_v29 = vadd.f32 %v1152_v44, %v2718_v62  ;;  %v1188_v23 = vmul.f32 %v2718_v62, %v2718_v62  ;;  %v1242_v52 = vadd.f32 %v1241_v59, %v1185_v4  ;;  %v2732_v22 = vmax.f32 %v782_v39, %v973_v40  ;;  %v793_v53 = vpop.f32.mrb[11].mxu1  ;;  %v906_v24 = vpop.f32.mrb[43].mxu0 }
 0x29d   :  { %v1284_v54 = vadd.f32 %v1283_v18, %v1187_v14  ;;  %v2734_v56 = vmax.f32 %v895_v42, %v975_v49  ;;  %v1263_v58 = vadd.f32 %v1262_v20, %v1186_v11  ;;  %v2736_v5 = vmax.f32 %v784_v17, %v974_v50 }
 0x29e   :  { %3887 = vst [vmem:[#allocation18_spill] sm:$0xff] %v2732_v22  ;;  %v1305_v16 = vadd.f32 %v1304_v25, %v1188_v23  ;;  %v2738_v43 = vmax.f32 %v897_v60, %v976_v30  ;;  %v1091_v44 = vadd.f32 %v1090_v26, %v2732_v22  ;;  %v1189_v28 = vmul.f32 %v2732_v22, %v2732_v22 }
 0x29f   :  { %3888 = vst [vmem:[#allocation19_spill] sm:$0xff] %v2734_v56  ;;  %3889 = vst [vmem:[#allocation20_spill] sm:$0xff] %v2736_v5  ;;  %v1133_v59 = vadd.f32 %v1132_v7, %v2734_v56  ;;  %v1191_v18 = vmul.f32 %v2734_v56, %v2734_v56  ;;  %v1112_v34 = vadd.f32 %v1111_v3, %v2736_v5 }
 0x2a0   :  { %3890 = vst [vmem:[#allocation21_spill] sm:$0xff] %v2738_v43  ;;  %v1190_v20 = vmul.f32 %v2736_v5, %v2736_v5  ;;  %v1154_v25 = vadd.f32 %v1153_v29, %v2738_v43  ;;  %v1192_v31 = vmul.f32 %v2738_v43, %v2738_v43  ;;  %v1243_v33 = vadd.f32 %v1242_v52, %v1189_v28 }
 0x2a1   :  { %v1285_v39 = vadd.f32 %v1284_v54, %v1191_v18  ;;  %v788_v42 = vadd.f32 %v787_v37, %v2645_v10  ;;  %v901_v45 = vadd.f32 %v900_v19, %v2648_v12  ;;  %v790_v60 = vadd.f32 %v789_v36, %v2651_v41  ;;  %v797_v49 = vpop.f32.mrb[12].mxu1  ;;  %v910_v50 = vpop.f32.mrb[44].mxu0 }
 0x2a2   :  { %v1264_v46 = vadd.f32 %v1263_v58, %v1190_v20  ;;  %v1306_v17 = vadd.f32 %v1305_v16, %v1192_v31  ;;  %v903_v40 = vadd.f32 %v902_v0, %v2654_v15  ;;  %v792_v4 = vadd.f32 %v791_v47, %v2645_v10  ;;  %v799_v14 = vpop.f32.mrb[13].mxu1  ;;  %v912_v3 = vpop.f32.mrb[45].mxu0 }
 0x2a3   :  { %v977_v30 = vmul.f32 0.2, %v788_v42  ;;  %v979_v26 = vmul.f32 0.2, %v901_v45  ;;  %v905_v7 = vadd.f32 %v904_v51, %v2648_v12  ;;  %v978_v11 = vmul.f32 0.2, %v790_v60 }
 0x2a4   :  { %v980_v37 = vmul.f32 0.2, %v903_v40  ;;  %v794_v19 = vadd.f32 %v793_v53, %v2651_v41  ;;  %v907_v29 = vadd.f32 %v906_v24, %v2654_v15  ;;  %v801_v23 = vpop.f32.mrb[14].mxu1  ;;  %v914_v36 = vpop.f32.mrb[46].mxu0  ;;  %v981_v54 = vmul.f32 0.2, %v792_v4 }
 0x2a5   :  { %v2760_v52 = vmax.f32 %v788_v42, %v977_v30  ;;  %v2762_v0 = vmax.f32 %v901_v45, %v979_v26  ;;  %v983_v58 = vmul.f32 0.2, %v905_v7  ;;  %v803_v16 = vpop.f32.mrb[15].mxu1  ;;  %v916_v47 = vpop.f32.mrb[47].mxu0  ;;  %v2764_v28 = vmax.f32 %v790_v60, %v978_v11 }
 0x2a6   :  { %v2766_v51 = vmax.f32 %v903_v40, %v980_v37  ;;  %v982_v18 = vmul.f32 0.2, %v794_v19  ;;  %v984_v20 = vmul.f32 0.2, %v907_v29  ;;  %v2780_v11 = vmax.f32 %v792_v4, %v981_v54 }
 0x2a7   :  { %3891 = vst [vmem:[#allocation22_spill] sm:$0xff] %v2760_v52  ;;  %3892 = vst [vmem:[#allocation23_spill] sm:$0xff] %v2762_v0  ;;  %v1092_v53 = vadd.f32 %v1091_v44, %v2760_v52  ;;  %v1193_v24 = vmul.f32 %v2760_v52, %v2760_v52  ;;  %v1134_v31 = vadd.f32 %v1133_v59, %v2762_v0 }
 0x2a8   :  { %3893 = vst [vmem:[#allocation24_spill] sm:$0xff] %v2764_v28  ;;  %3894 = vst [vmem:[#allocation25_spill] sm:$0xff] %v2766_v51  ;;  %v1195_v42 = vmul.f32 %v2762_v0, %v2762_v0  ;;  %v1113_v45 = vadd.f32 %v1112_v34, %v2764_v28  ;;  %v1194_v60 = vmul.f32 %v2764_v28, %v2764_v28 }
 0x2a9   :  { %v1155_v40 = vadd.f32 %v1154_v25, %v2766_v51  ;;  %v1196_v30 = vmul.f32 %v2766_v51, %v2766_v51  ;;  %v1244_v26 = vadd.f32 %v1243_v33, %v1193_v24  ;;  %3895 = vst [vmem:[#allocation26_spill] sm:$0xff] %v2780_v11  ;;  %v2782_v37 = vmax.f32 %v905_v7, %v983_v58  ;;  %v2788_v34 = vpop.f32.mrb[16].mxu1  ;;  %v2790_v28 = vpop.f32.mrb[48].mxu0 }
 0x2aa   :  { %v1286_v44 = vadd.f32 %v1285_v39, %v1195_v42  ;;  %v1265_v59 = vadd.f32 %v1264_v46, %v1194_v60  ;;  %v2784_v43 = vmax.f32 %v794_v19, %v982_v18  ;;  %v2786_v0 = vmax.f32 %v907_v29, %v984_v20  ;;  %v2798_v46 = vpop.f32.mrb[17].mxu1 }
 0x2ab   :  { %3896 = vst [vmem:[#allocation27_spill] sm:$0xff] %v2782_v37  ;;  %v1307_v52 = vadd.f32 %v1306_v17, %v1196_v30  ;;  %v1093_v25 = vadd.f32 %v1092_v53, %v2780_v11  ;;  %v1197_v33 = vmul.f32 %v2780_v11, %v2780_v11  ;;  %v1135_v39 = vadd.f32 %v1134_v31, %v2782_v37  ;;  %v2800_v17 = vpop.f32.mrb[49].mxu0  ;;  %v2808_v58 = vpop.f32.mrb[18].mxu1 }
 0x2ac   :  { %3897 = vst [vmem:[#allocation28_spill] sm:$0xff] %v2784_v43  ;;  %3898 = vst [vmem:[#allocation29_spill] sm:$0xff] %v2786_v0  ;;  %v1199_v4 = vmul.f32 %v2782_v37, %v2782_v37  ;;  %v1114_v7 = vadd.f32 %v1113_v45, %v2784_v43  ;;  %v1198_v19 = vmul.f32 %v2784_v43, %v2784_v43  ;;  %v2810_v18 = vpop.f32.mrb[50].mxu0  ;;  %v2814_v42 = vpop.f32.mrb[19].mxu1 }
 0x2ad   :  { %v1156_v29 = vadd.f32 %v1155_v40, %v2786_v0  ;;  %v1200_v54 = vmul.f32 %v2786_v0, %v2786_v0  ;;  %v1245_v20 = vadd.f32 %v1244_v26, %v1197_v33  ;;  %v798_v24 = vadd.f32 %v797_v49, %v2645_v10  ;;  %v2816_v45 = vpop.f32.mrb[51].mxu0 }
 0x2ae   :  { %v1287_v53 = vadd.f32 %v1286_v44, %v1199_v4  ;;  %v911_v31 = vadd.f32 %v910_v50, %v2648_v12  ;;  %v1266_v60 = vadd.f32 %v1265_v59, %v1198_v19  ;;  %v800_v40 = vadd.f32 %v799_v14, %v2651_v41 }
 0x2af   :  { %v1308_v30 = vadd.f32 %v1307_v52, %v1200_v54  ;;  %v913_v0 = vadd.f32 %v912_v3, %v2654_v15  ;;  %v985_v37 = vmul.f32 0.2, %v798_v24  ;;  %v802_v11 = vadd.f32 %v801_v23, %v2645_v10 }
 0x2b0   :  { %v987_v43 = vmul.f32 0.2, %v911_v31  ;;  %v915_v26 = vadd.f32 %v914_v36, %v2648_v12  ;;  %v986_v44 = vmul.f32 0.2, %v800_v40  ;;  %v804_v50 = vadd.f32 %v803_v16, %v2651_v41 }
 0x2b1   :  { %v988_v49 = vmul.f32 0.2, %v913_v0  ;;  %v917_v33 = vadd.f32 %v916_v47, %v2654_v15  ;;  %v2824_v4 = vmax.f32 %v798_v24, %v985_v37  ;;  %v989_v52 = vmul.f32 0.2, %v802_v11  ;;  %v2832_v51 = vpop.f32.mrb[20].mxu1  ;;  %v2834_v36 = vpop.f32.mrb[52].mxu0 }
 0x2b2   :  { %v2826_v59 = vmax.f32 %v911_v31, %v987_v43  ;;  %v991_v14 = vmul.f32 0.2, %v915_v26  ;;  %v2828_v19 = vmax.f32 %v800_v40, %v986_v44  ;;  %v990_v54 = vmul.f32 0.2, %v804_v50  ;;  %v2842_v24 = vpop.f32.mrb[21].mxu1 }
 0x2b3   :  { %3899 = vst [vmem:[#allocation30_spill] sm:$0xff] %v2824_v4  ;;  %v2830_v3 = vmax.f32 %v913_v0, %v988_v49  ;;  %v992_v23 = vmul.f32 0.2, %v917_v33  ;;  %v1094_v16 = vadd.f32 %v1093_v25, %v2824_v4  ;;  %v1201_v47 = vmul.f32 %v2824_v4, %v2824_v4  ;;  %v2844_v0 = vpop.f32.mrb[53].mxu0  ;;  %v2852_v49 = vpop.f32.mrb[22].mxu1 }
 0x2b4   :  { %3900 = vst [vmem:[#allocation31_spill] sm:$0xff] %v2826_v59  ;;  %3901 = vst [vmem:[#allocation32_spill] sm:$0xff] %v2828_v19  ;;  %v1136_v43 = vadd.f32 %v1135_v39, %v2826_v59  ;;  %v1203_v37 = vmul.f32 %v2826_v59, %v2826_v59  ;;  %v1115_v31 = vadd.f32 %v1114_v7, %v2828_v19  ;;  %v2854_v39 = vpop.f32.mrb[54].mxu0  ;;  %v2860_v22 = vpop.f32.mrb[23].mxu1 }
 0x2b5   :  { %3902 = vst [vmem:[#allocation33_spill] sm:$0xff] %v2830_v3  ;;  %v1202_v40 = vmul.f32 %v2828_v19, %v2828_v19  ;;  %v1157_v44 = vadd.f32 %v1156_v29, %v2830_v3  ;;  %v1204_v25 = vmul.f32 %v2830_v3, %v2830_v3  ;;  %v1246_v4 = vadd.f32 %v1245_v20, %v1201_v47  ;;  %v2862_v7 = vpop.f32.mrb[55].mxu0 }
 0x2b6   :  { %v1288_v59 = vadd.f32 %v1287_v53, %v1203_v37  ;;  %v2856_v56 = vmax.f32 %v802_v11, %v989_v52  ;;  %v2858_v5 = vmax.f32 %v915_v26, %v991_v14  ;;  %v2864_v29 = vmax.f32 %v804_v50, %v990_v54 }
 0x2b7   :  { %v1267_v19 = vadd.f32 %v1266_v60, %v1202_v40  ;;  %v1309_v62 = vadd.f32 %v1308_v30, %v1204_v25  ;;  %v2866_v32 = vmax.f32 %v917_v33, %v992_v23  ;;  %v808_v14 = vadd.f32 %v2788_v34, %v2645_v10 }
 0x2b8   :  { %3903 = vst [vmem:[#allocation34_spill] sm:$0xff] %v2856_v56  ;;  %3904 = vst [vmem:[#allocation35_spill] sm:$0xff] %v2858_v5  ;;  %v1095_v3 = vadd.f32 %v1094_v16, %v2856_v56  ;;  %v1205_v20 = vmul.f32 %v2856_v56, %v2856_v56  ;;  %v1137_v11 = vadd.f32 %v1136_v43, %v2858_v5 }
 0x2b9   :  { %3905 = vst [vmem:[#allocation36_spill] sm:$0xff] %v2864_v29  ;;  %3906 = vst [vmem:[#allocation37_spill] sm:$0xff] %v2866_v32  ;;  %v1207_v53 = vmul.f32 %v2858_v5, %v2858_v5  ;;  %v1116_v26 = vadd.f32 %v1115_v31, %v2864_v29  ;;  %v1206_v60 = vmul.f32 %v2864_v29, %v2864_v29  ;;  %v2888_v37 = vpop.f32.mrb[24].mxu1  ;;  %v2890_v31 = vpop.f32.mrb[56].mxu0 }
 0x2ba   :  { %v1158_v30 = vadd.f32 %v1157_v44, %v2866_v32  ;;  %v1208_v50 = vmul.f32 %v2866_v32, %v2866_v32  ;;  %v1247_v33 = vadd.f32 %v1246_v4, %v1205_v20  ;;  %v921_v54 = vadd.f32 %v2790_v28, %v2648_v12 }
 0x2bb   :  { %v1289_v52 = vadd.f32 %v1288_v59, %v1207_v53  ;;  %v1268_v23 = vadd.f32 %v1267_v19, %v1206_v60  ;;  %v810_v47 = vadd.f32 %v2798_v46, %v2651_v41  ;;  %v923_v43 = vadd.f32 %v2800_v17, %v2654_v15  ;;  %v2896_v19 = vpop.f32.mrb[25].mxu1 }
 0x2bc   :  { %v1310_v16 = vadd.f32 %v1309_v62, %v1208_v50  ;;  %v993_v4 = vmul.f32 0.2, %v808_v14  ;;  %v995_v59 = vmul.f32 0.2, %v921_v54  ;;  %v812_v34 = vadd.f32 %v2808_v58, %v2645_v10  ;;  %v2898_v62 = vpop.f32.mrb[57].mxu0  ;;  %v2904_v25 = vpop.f32.mrb[26].mxu1 }
 0x2bd   :  { %v925_v28 = vadd.f32 %v2810_v18, %v2648_v12  ;;  %v994_v46 = vmul.f32 0.2, %v810_v47  ;;  %v996_v40 = vmul.f32 0.2, %v923_v43  ;;  %v814_v17 = vadd.f32 %v2814_v42, %v2651_v41  ;;  %v2906_v20 = vpop.f32.mrb[58].mxu0  ;;  %v2912_v50 = vpop.f32.mrb[27].mxu1 }
 0x2be   :  { %v927_v44 = vadd.f32 %v2816_v45, %v2654_v15  ;;  %v2908_v58 = vmax.f32 %v808_v14, %v993_v4  ;;  %v2910_v53 = vmax.f32 %v921_v54, %v995_v59  ;;  %v997_v18 = vmul.f32 0.2, %v812_v34  ;;  %v2914_v32 = vpop.f32.mrb[59].mxu0 }
 0x2bf   :  { %v999_v60 = vmul.f32 0.2, %v925_v28  ;;  %v2916_v5 = vmax.f32 %v810_v47, %v994_v46  ;;  %v2918_v42 = vmax.f32 %v923_v43, %v996_v40  ;;  %v998_v29 = vmul.f32 0.2, %v814_v17 }
 0x2c0   :  { %3907 = vst [vmem:[#allocation38_spill] sm:$0xff] %v2908_v58  ;;  %3908 = vst [vmem:[#allocation39_spill] sm:$0xff] %v2910_v53  ;;  %v1000_v45 = vmul.f32 0.2, %v927_v44  ;;  %v1096_v56 = vadd.f32 %v1095_v3, %v2908_v58  ;;  %v1209_v14 = vmul.f32 %v2908_v58, %v2908_v58  ;;  %v1138_v54 = vadd.f32 %v1137_v11, %v2910_v53 }
 0x2c1   :  { %3909 = vst [vmem:[#allocation40_spill] sm:$0xff] %v2916_v5  ;;  %3910 = vst [vmem:[#allocation41_spill] sm:$0xff] %v2918_v42  ;;  %v1211_v4 = vmul.f32 %v2910_v53, %v2910_v53  ;;  %v1117_v59 = vadd.f32 %v1116_v26, %v2916_v5  ;;  %v1210_v47 = vmul.f32 %v2916_v5, %v2916_v5  ;;  %v2940_v26 = vpop.f32.mrb[28].mxu1  ;;  %v2942_v5 = vpop.f32.mrb[60].mxu0 }
 0x2c2   :  { %v1159_v43 = vadd.f32 %v1158_v30, %v2918_v42  ;;  %v1212_v46 = vmul.f32 %v2918_v42, %v2918_v42  ;;  %v1248_v40 = vadd.f32 %v1247_v33, %v1209_v14  ;;  %v2932_v57 = vmax.f32 %v812_v34, %v997_v18 }
 0x2c3   :  { %v1290_v3 = vadd.f32 %v1289_v52, %v1211_v4  ;;  %v2934_v58 = vmax.f32 %v925_v28, %v999_v60  ;;  %v1269_v11 = vadd.f32 %v1268_v23, %v1210_v47  ;;  %v2936_v61 = vmax.f32 %v814_v17, %v998_v29  ;;  %v2950_v23 = vpop.f32.mrb[29].mxu1  ;;  %v2952_v29 = vpop.f32.mrb[61].mxu0 }
 0x2c4   :  { %3911 = vst [vmem:[#allocation42_spill] sm:$0xff] %v2932_v57  ;;  %v1311_v48 = vadd.f32 %v1310_v16, %v1212_v46  ;;  %v2938_v53 = vmax.f32 %v927_v44, %v1000_v45  ;;  %v1097_v30 = vadd.f32 %v1096_v56, %v2932_v57  ;;  %v1213_v33 = vmul.f32 %v2932_v57, %v2932_v57  ;;  %v2960_v44 = vpop.f32.mrb[30].mxu1  ;;  %v2962_v18 = vpop.f32.mrb[62].mxu0 }
 0x2c5   :  { %3912 = vst [vmem:[#allocation43_spill] sm:$0xff] %v2934_v58  ;;  %3913 = vst [vmem:[#allocation44_spill] sm:$0xff] %v2936_v61  ;;  %v1139_v52 = vadd.f32 %v1138_v54, %v2934_v58  ;;  %v1215_v34 = vmul.f32 %v2934_v58, %v2934_v58  ;;  %v1118_v16 = vadd.f32 %v1117_v59, %v2936_v61  ;;  %v2968_v4 = vpop.f32.mrb[31].mxu1  ;;  %v2970_v59 = vpop.f32.mrb[63].mxu0 }
 0x2c6   :  { %3914 = vst [vmem:[#allocation45_spill] sm:$0xff] %v2938_v53  ;;  %v1214_v28 = vmul.f32 %v2936_v61, %v2936_v61  ;;  %v1160_v17 = vadd.f32 %v1159_v43, %v2938_v53  ;;  %v1216_v56 = vmul.f32 %v2938_v53, %v2938_v53  ;;  %v1249_v60 = vadd.f32 %v1248_v40, %v1213_v33 }
 0x2c7   :  { %v1291_v45 = vadd.f32 %v1290_v3, %v1215_v34  ;;  %v818_v14 = vadd.f32 %v2832_v51, %v2645_v10  ;;  %v931_v54 = vadd.f32 %v2834_v36, %v2648_v12  ;;  %v820_v46 = vadd.f32 %v2842_v24, %v2651_v41 }
 0x2c8   :  { %v1270_v47 = vadd.f32 %v1269_v11, %v1214_v28  ;;  %v1312_v43 = vadd.f32 %v1311_v48, %v1216_v56  ;;  %v933_v53 = vadd.f32 %v2844_v0, %v2654_v15  ;;  %v822_v51 = vadd.f32 %v2852_v49, %v2645_v10 }
 0x2c9   :  { %v1001_v40 = vmul.f32 0.2, %v818_v14  ;;  %v1003_v3 = vmul.f32 0.2, %v931_v54  ;;  %v935_v36 = vadd.f32 %v2854_v39, %v2648_v12  ;;  %v1002_v33 = vmul.f32 0.2, %v820_v46 }
 0x2ca   :  { %v1004_v34 = vmul.f32 0.2, %v933_v53  ;;  %v824_v11 = vadd.f32 %v2860_v22, %v2651_v41  ;;  %v937_v48 = vadd.f32 %v2862_v7, %v2654_v15  ;;  %v1005_v0 = vmul.f32 0.2, %v822_v51 }
 0x2cb   :  { %v2984_v24 = vmax.f32 %v818_v14, %v1001_v40  ;;  %v2986_v28 = vmax.f32 %v931_v54, %v1003_v3  ;;  %v1007_v56 = vmul.f32 0.2, %v935_v36  ;;  %v2988_v58 = vmax.f32 %v820_v46, %v1002_v33 }
 0x2cc   :  { %v2990_v49 = vmax.f32 %v933_v53, %v1004_v34  ;;  %v1006_v61 = vmul.f32 0.2, %v824_v11  ;;  %v1008_v39 = vmul.f32 0.2, %v937_v48  ;;  %v3004_v3 = vmax.f32 %v822_v51, %v1005_v0 }
 0x2cd   :  { %3915 = vst [vmem:[#allocation46_spill] sm:$0xff] %v2984_v24  ;;  %3916 = vst [vmem:[#allocation47_spill] sm:$0xff] %v2986_v28  ;;  %v1098_v57 = vadd.f32 %v1097_v30, %v2984_v24  ;;  %v1217_v22 = vmul.f32 %v2984_v24, %v2984_v24  ;;  %v1140_v42 = vadd.f32 %v1139_v52, %v2986_v28 }
 0x2ce   :  { %3917 = vst [vmem:[#allocation48_spill] sm:$0xff] %v2988_v58  ;;  %v1219_v7 = vmul.f32 %v2986_v28, %v2986_v28  ;;  %v1119_v14 = vadd.f32 %v1118_v16, %v2988_v58  ;;  %v1218_v54 = vmul.f32 %v2988_v58, %v2988_v58  ;;  %v1161_v53 = vadd.f32 %v1160_v17, %v2990_v49 }
 0x2cf   :  { %v1220_v46 = vmul.f32 %v2990_v49, %v2990_v49  ;;  %v1250_v40 = vadd.f32 %v1249_v60, %v1217_v22  ;;  %v3006_v33 = vmax.f32 %v935_v36, %v1007_v56  ;;  %v3008_v24 = vmax.f32 %v824_v11, %v1006_v61 }
 0x2d0   :  { %v1292_v30 = vadd.f32 %v1291_v45, %v1219_v7  ;;  %v1271_v52 = vadd.f32 %v1270_v47, %v1218_v54  ;;  %v3010_v28 = vmax.f32 %v937_v48, %v1008_v39  ;;  %v1099_v16 = vadd.f32 %v1098_v57, %v3004_v3 }
 0x2d1   :  { %v1313_v34 = vadd.f32 %v1312_v43, %v1220_v46  ;;  %v1221_v17 = vmul.f32 %v3004_v3, %v3004_v3  ;;  %v1141_v58 = vadd.f32 %v1140_v42, %v3006_v33  ;;  %v1223_v60 = vmul.f32 %v3006_v33, %v3006_v33 }
 0x2d2   :  { %v1120_v45 = vadd.f32 %v1119_v14, %v3008_v24  ;;  %v1222_v47 = vmul.f32 %v3008_v24, %v3008_v24  ;;  %v1162_v61 = vadd.f32 %v1161_v53, %v3010_v28  ;;  %v1224_v43 = vmul.f32 %v3010_v28, %v3010_v28 }
 0x2d3   :  { %v1251_v51 = vadd.f32 %v1250_v40, %v1221_v17  ;;  %v1293_v57 = vadd.f32 %v1292_v30, %v1223_v60  ;;  %v828_v36 = vadd.f32 %v2888_v37, %v2645_v10  ;;  %v941_v42 = vadd.f32 %v2890_v31, %v2648_v12 }
 0x2d4   :  { %v1272_v11 = vadd.f32 %v1271_v52, %v1222_v47  ;;  %v1314_v48 = vadd.f32 %v1313_v34, %v1224_v43  ;;  %v830_v0 = vadd.f32 %v2896_v19, %v2651_v41  ;;  %v943_v56 = vadd.f32 %v2898_v62, %v2654_v15 }
 0x2d5   :  { %v1009_v39 = vmul.f32 0.2, %v828_v36  ;;  %v1011_v22 = vmul.f32 0.2, %v941_v42  ;;  %v832_v7 = vadd.f32 %v2904_v25, %v2645_v10  ;;  %v945_v14 = vadd.f32 %v2906_v20, %v2648_v12 }
 0x2d6   :  { %v1010_v37 = vmul.f32 0.2, %v830_v0  ;;  %v1012_v54 = vmul.f32 0.2, %v943_v56  ;;  %v834_v31 = vadd.f32 %v2912_v50, %v2651_v41  ;;  %v947_v53 = vadd.f32 %v2914_v32, %v2654_v15 }
 0x2d7   :  { %v3040_v19 = vmax.f32 %v828_v36, %v1009_v39  ;;  %v3042_v46 = vmax.f32 %v941_v42, %v1011_v22  ;;  %v1013_v62 = vmul.f32 0.2, %v832_v7  ;;  %v1015_v40 = vmul.f32 0.2, %v945_v14 }
 0x2d8   :  { %v3044_v30 = vmax.f32 %v830_v0, %v1010_v37  ;;  %v3046_v25 = vmax.f32 %v943_v56, %v1012_v54  ;;  %v1014_v52 = vmul.f32 0.2, %v834_v31  ;;  %v1016_v20 = vmul.f32 0.2, %v947_v53 }
 0x2d9   :  { %v1100_v34 = vadd.f32 %v1099_v16, %v3040_v19  ;;  %v1225_v50 = vmul.f32 %v3040_v19, %v3040_v19  ;;  %v1142_v17 = vadd.f32 %v1141_v58, %v3042_v46  ;;  %v1227_v32 = vmul.f32 %v3042_v46, %v3042_v46 }
 0x2da   :  { %3918 = vst [vmem:[#allocation49_spill] sm:$0xff] %v3046_v25  ;;  %v1121_v60 = vadd.f32 %v1120_v45, %v3044_v30  ;;  %v1226_v47 = vmul.f32 %v3044_v30, %v3044_v30  ;;  %v1163_v43 = vadd.f32 %v1162_v61, %v3046_v25  ;;  %v1228_v36 = vmul.f32 %v3046_v25, %v3046_v25 }
 0x2db   :  { %v1252_v42 = vadd.f32 %v1251_v51, %v1225_v50  ;;  %v1294_v16 = vadd.f32 %v1293_v57, %v1227_v32  ;;  %v3060_v0 = vmax.f32 %v832_v7, %v1013_v62  ;;  %v3062_v56 = vmax.f32 %v945_v14, %v1015_v40 }
 0x2dc   :  { %v1273_v58 = vadd.f32 %v1272_v11, %v1226_v47  ;;  %v1315_v39 = vadd.f32 %v1314_v48, %v1228_v36  ;;  %v3064_v22 = vmax.f32 %v834_v31, %v1014_v52  ;;  %v3066_v37 = vmax.f32 %v947_v53, %v1016_v20 }
 0x2dd   :  { %v1101_v45 = vadd.f32 %v1100_v34, %v3060_v0  ;;  %v1229_v61 = vmul.f32 %v3060_v0, %v3060_v0  ;;  %v1143_v54 = vadd.f32 %v1142_v17, %v3062_v56  ;;  %v1231_v51 = vmul.f32 %v3062_v56, %v3062_v56 }
 0x2de   :  { %v1122_v57 = vadd.f32 %v1121_v60, %v3064_v22  ;;  %v1230_v11 = vmul.f32 %v3064_v22, %v3064_v22  ;;  %v1164_v48 = vadd.f32 %v1163_v43, %v3066_v37  ;;  %v1232_v7 = vmul.f32 %v3066_v37, %v3066_v37 }
 0x2df   :  { %v1253_v14 = vadd.f32 %v1252_v42, %v1229_v61  ;;  %v1295_v31 = vadd.f32 %v1294_v16, %v1231_v51  ;;  %v838_v53 = vadd.f32 %v2940_v26, %v2645_v10  ;;  %v951_v62 = vadd.f32 %v2942_v5, %v2648_v12 }
 0x2e0   :  { %v1274_v40 = vadd.f32 %v1273_v58, %v1230_v11  ;;  %v1316_v52 = vadd.f32 %v1315_v39, %v1232_v7  ;;  %v840_v20 = vadd.f32 %v2950_v23, %v2651_v41  ;;  %v953_v34 = vadd.f32 %v2952_v29, %v2654_v15 }
 0x2e1   :  { %v1017_v50 = vmul.f32 0.2, %v838_v53  ;;  %v1019_v17 = vmul.f32 0.2, %v951_v62  ;;  %v842_v32 = vadd.f32 %v2960_v44, %v2645_v10  ;;  %v955_v60 = vadd.f32 %v2962_v18, %v2648_v12 }
 0x2e2   :  { %v1018_v26 = vmul.f32 0.2, %v840_v20  ;;  %v1020_v47 = vmul.f32 0.2, %v953_v34  ;;  %v844_v5 = vadd.f32 %v2968_v4, %v2651_v41  ;;  %v957_v43 = vadd.f32 %v2970_v59, %v2654_v15 }
 0x2e3   :  { %v3096_v23 = vmax.f32 %v838_v53, %v1017_v50  ;;  %v3098_v36 = vmax.f32 %v951_v62, %v1019_v17  ;;  %v1021_v29 = vmul.f32 0.2, %v842_v32  ;;  %v1023_v42 = vmul.f32 0.2, %v955_v60 }
 0x2e4   :  { %v3100_v16 = vmax.f32 %v840_v20, %v1018_v26  ;;  %v3102_v10 = vmax.f32 %v953_v34, %v1020_v47  ;;  %v1022_v44 = vmul.f32 0.2, %v844_v5  ;;  %v1024_v12 = vmul.f32 0.2, %v957_v43 }
 0x2e5   :  { %v1102_v18 = vadd.f32 %v1101_v45, %v3096_v23  ;;  %v1233_v41 = vmul.f32 %v3096_v23, %v3096_v23  ;;  %v1144_v4 = vadd.f32 %v1143_v54, %v3098_v36  ;;  %v1235_v15 = vmul.f32 %v3098_v36, %v3098_v36 }
 0x2e6   :  { %v1123_v59 = vadd.f32 %v1122_v57, %v3100_v16  ;;  %v1234_v58 = vmul.f32 %v3100_v16, %v3100_v16  ;;  %v1165_v39 = vadd.f32 %v1164_v48, %v3102_v10  ;;  %v1236_v61 = vmul.f32 %v3102_v10, %v3102_v10 }
 0x2e7   :  { %v1254_v51 = vadd.f32 %v1253_v14, %v1233_v41  ;;  %v1296_v45 = vadd.f32 %v1295_v31, %v1235_v15  ;;  %v3116_v11 = vmax.f32 %v842_v32, %v1021_v29  ;;  %v3118_v7 = vmax.f32 %v955_v60, %v1023_v42 }
 0x2e8   :  { %v1275_v54 = vadd.f32 %v1274_v40, %v1234_v58  ;;  %v1317_v53 = vadd.f32 %v1316_v52, %v1236_v61  ;;  %v3120_v62 = vmax.f32 %v844_v5, %v1022_v44  ;;  %v3122_v20 = vmax.f32 %v957_v43, %v1024_v12 }
 0x2e9   :  { %v1103_v57 = vadd.f32 %v1102_v18, %v3116_v11  ;;  %v1237_v48 = vmul.f32 %v3116_v11, %v3116_v11  ;;  %v1145_v34 = vadd.f32 %v1144_v4, %v3118_v7  ;;  %v1239_v14 = vmul.f32 %v3118_v7, %v3118_v7 }
 0x2ea   :  { %3919 = vst [vmem:[#allocation50_spill] sm:$0xff] %v3122_v20  ;;  %v1124_v31 = vadd.f32 %v1123_v59, %v3120_v62  ;;  %v1238_v40 = vmul.f32 %v3120_v62, %v3120_v62  ;;  %v1166_v52 = vadd.f32 %v1165_v39, %v3122_v20  ;;  %v1240_v50 = vmul.f32 %v3122_v20, %v3122_v20 }
 0x2eb   :  { %v1104_v17 = vrot.slane %v1103_v57, 4  ;;  %v1255_v32 = vadd.f32 %v1254_v51, %v1237_v48  ;;  %v1146_v60 = vrot.slane %v1145_v34, 4  ;;  %v1297_v26 = vadd.f32 %v1296_v45, %v1239_v14 }
 0x2ec   :  { %v1125_v47 = vrot.slane %v1124_v31, 4  ;;  %v1276_v5 = vadd.f32 %v1275_v54, %v1238_v40  ;;  %v1167_v43 = vrot.slane %v1166_v52, 4  ;;  %v1318_v29 = vadd.f32 %v1317_v53, %v1240_v50 }
 0x2ed   :  { %v1105_v42 = vadd.f32 %v1104_v17, %v1103_v57  ;;  %v1256_v44 = vrot.slane %v1255_v32, 4  ;;  %v1147_v12 = vadd.f32 %v1146_v60, %v1145_v34  ;;  %v1298_v18 = vrot.slane %v1297_v26, 4 }
 0x2ee   :  { %v1126_v41 = vadd.f32 %v1125_v47, %v1124_v31  ;;  %v1277_v4 = vrot.slane %v1276_v5, 4  ;;  %v1168_v15 = vadd.f32 %v1167_v43, %v1166_v52  ;;  %v1319_v59 = vrot.slane %v1318_v29, 4 }
 0x2ef   :  { %v1106_v58 = vrot.slane %v1105_v42, 2  ;;  %v1257_v39 = vadd.f32 %v1256_v44, %v1255_v32  ;;  %v1148_v61 = vrot.slane %v1147_v12, 2  ;;  %v1299_v25 = vadd.f32 %v1298_v18, %v1297_v26 }
 0x2f0   :  { %v1127_v20 = vrot.slane %v1126_v41, 2  ;;  %v1278_v51 = vadd.f32 %v1277_v4, %v1276_v5  ;;  %v1169_v48 = vrot.slane %v1168_v15, 2  ;;  %v1320_v45 = vadd.f32 %v1319_v59, %v1318_v29 }
 0x2f1   :  { %v1107_v14 = vadd.f32 %v1106_v58, %v1105_v42  ;;  %v1258_v54 = vrot.slane %v1257_v39, 2  ;;  %v1149_v40 = vadd.f32 %v1148_v61, %v1147_v12  ;;  %v1300_v53 = vrot.slane %v1299_v25, 2 }
 0x2f2   :  { %v1128_v57 = vadd.f32 %v1127_v20, %v1126_v41  ;;  %v1279_v50 = vrot.slane %v1278_v51, 2  ;;  %v1170_v34 = vadd.f32 %v1169_v48, %v1168_v15  ;;  %v1321_v17 = vrot.slane %v1320_v45, 2 }
 0x2f3   :  { %v1108_v31 = vrot.slane %v1107_v14, 1  ;;  %v1259_v60 = vadd.f32 %v1258_v54, %v1257_v39  ;;  %v1150_v52 = vrot.slane %v1149_v40, 1  ;;  %v1301_v47 = vadd.f32 %v1300_v53, %v1299_v25 }
 0x2f4   :  { %v1129_v43 = vrot.slane %v1128_v57, 1  ;;  %v1280_v32 = vadd.f32 %v1279_v50, %v1278_v51  ;;  %v1171_v44 = vrot.slane %v1170_v34, 1  ;;  %v1322_v26 = vadd.f32 %v1321_v17, %v1320_v45 }
 0x2f5   :  { %v1109_v18 = vadd.f32 %v1108_v31, %v1107_v14  ;;  %v1260_v5 = vrot.slane %v1259_v60, 1  ;;  %v1151_v4 = vadd.f32 %v1150_v52, %v1149_v40  ;;  %v1302_v29 = vrot.slane %v1301_v47, 1 }
 0x2f6   :  { %v1130_v42 = vadd.f32 %v1129_v43, %v1128_v57  ;;  %v1281_v59 = vrot.slane %v1280_v32, 1  ;;  %v1172_v12 = vadd.f32 %v1171_v44, %v1170_v34  ;;  %v1323_v58 = vrot.slane %v1322_v26, 1 }
 0x2f7   :  { %v1173_v20 = vmul.f32 0.0078125, %v1109_v18  ;;  %v1261_v41 = vadd.f32 %v1260_v5, %v1259_v60  ;;  %v1175_v15 = vmul.f32 0.0078125, %v1151_v4  ;;  %v1303_v61 = vadd.f32 %v1302_v29, %v1301_v47 }
 0x2f8   :  { %v1174_v48 = vmul.f32 0.0078125, %v1130_v42  ;;  %v1282_v39 = vadd.f32 %v1281_v59, %v1280_v32  ;;  %v1176_v54 = vmul.f32 0.0078125, %v1172_v12  ;;  %v1324_v25 = vadd.f32 %v1323_v58, %v1322_v26 }
 0x2f9   :  { %v1325_v53 = vmul.f32 0.0078125, %v1261_v41  ;;  %v1329_v51 = vmul.f32 %v1173_v20, %v1173_v20  ;;  %v1327_v50 = vmul.f32 0.0078125, %v1303_v61  ;;  %v1331_v45 = vmul.f32 %v1175_v15, %v1175_v15 }
 0x2fa   :  { %v1326_v14 = vmul.f32 0.0078125, %v1282_v39  ;;  %v1330_v17 = vmul.f32 %v1174_v48, %v1174_v48  ;;  %v1328_v40 = vmul.f32 0.0078125, %v1324_v25  ;;  %v1332_v31 = vmul.f32 %v1176_v54, %v1176_v54 }
 0x2fb   :  { %v1333_v57 = vsub.f32 %v1325_v53, %v1329_v51  ;;  %v1335_v52 = vsub.f32 %v1327_v50, %v1331_v45  ;;  %v959_v53 = vld [vmem:[%s3839_s7] sm:$0xf] }
 0x2fc   :  { %v1334_v34 = vsub.f32 %v1326_v14, %v1330_v17  ;;  %v1336_v43 = vsub.f32 %v1328_v40, %v1332_v31 }
 0x2fd   :  { %v1337_v44 = vmax.f32 %v1333_v57, 0.0  ;;  %v1339_v60 = vmax.f32 %v1335_v52, 0.0 }
 0x2fe   :  { %v1338_v18 = vmax.f32 %v1334_v34, 0.0  ;;  %v1340_v47 = vmax.f32 %v1336_v43, 0.0 }
 0x2ff   :  { %v1341_v5 = vadd.f32 1e-05, %v1337_v44  ;;  %v1343_v32 = vadd.f32 1e-05, %v1339_v60 }
 0x300   :  { %v1342_v4 = vadd.f32 1e-05, %v1338_v18  ;;  %v1344_v26 = vadd.f32 1e-05, %v1340_v47  ;;  %v3921_v47 = vld [vmem:[#allocation14_spill] sm:$0xff] }
 0x301   :  { %2078 = vrsqrt.f32 %v1341_v5 }
 0x302   :  { %2080 = vrsqrt.f32 %v1343_v32  ;;  %v3922_v32 = vld [vmem:[#allocation16_spill] sm:$0xff] }
 0x303   :  { %2082 = vrsqrt.f32 %v1342_v4  ;;  %v3923_v4 = vld [vmem:[#allocation15_spill] sm:$0xff] }
 0x304   :  { %2084 = vrsqrt.f32 %v1344_v26  ;;  %v3924_v26 = vld [vmem:[#allocation17_spill] sm:$0xff] }
 0x30b   :  { %v2079_v29 = vpop.eup %2078 }
 0x30c   :  { %v2081_v42 = vpop.eup %2080 }
 0x30d   :  { %v2083_v59 = vpop.eup %2082 }
 0x30e   :  { %v2085_v12 = vpop.eup %2084  ;;  %v1353_v58 = vcombine.low %v2079_v29, %v2083_v59 }
 0x30f   :  { %v1354_v41 = vcombine.low %v2081_v42, %v2085_v12  ;;  %v3925_v42 = vld [vmem:[#allocation18_spill] sm:$0xff]  ;;  %v3926_v12 = vld [vmem:[#allocation20_spill] sm:$0xff] }
 0x310   :  { %v1361_v61 = vrot.slane %v1353_v58, %v2497_v55 }
 0x311   :  { %v1368_v39 = vrot.slane %v1354_v41, %v2497_v55  ;;  %v3927_v41 = vld [vmem:[#allocation19_spill] sm:$0xff] }
 0x313   :  { %v1369_v25 = vcombine.low %v1361_v61, %v1368_v39 }
 0x315   :  { %v1376_v51 = vrot.slane %v1369_v25, %v2497_v55  ;;  %v3928_v25 = vld [vmem:[#allocation21_spill] sm:$0xff] }
 0x317   :  { %v1378_v50 = vmul.f32 %v1376_v51, %v959_v53  ;;  %v3929_v51 = vld [vmem:[#allocation22_spill] sm:$0xff] }
 0x319   :  { %v3143_v45 = vrot.slane %v1378_v50, %v2278_v35  ;;  %v3146_v14 = vrot.slane %v1378_v50, %v2284_v38  ;;  %v3149_v17 = vrot.slane %v1378_v50, %v2636_v1  ;;  %v3152_v40 = vrot.slane %v1378_v50, %v2642_v8 }
 0x31b   :  { %v1400_v31 = vmul.f32 %v3143_v45, %v1173_v20  ;;  %v1401_v57 = vmul.f32 %v3146_v14, %v1174_v48  ;;  %v1402_v52 = vmul.f32 %v3149_v17, %v1175_v15  ;;  %v1403_v34 = vmul.f32 %v3152_v40, %v1176_v54 }
 0x31c   :  { %v3160_v43 = vmul.f32 %v3143_v45, %v2664_v2  ;;  %v3164_v44 = vmul.f32 %v3146_v14, %v2668_v9  ;;  %v3168_v60 = vmul.f32 %v3149_v17, %v2666_v6  ;;  %v3172_v48 = vmul.f32 %v3152_v40, %v2670_v13  ;;  %v3920_v6 = vld [vmem:[#allocation13_spill] sm:$0xff] }
 0x31d   :  { %v1408_v18 = vcombine.low %v1400_v31, %v1401_v57  ;;  %v1409_v20 = vcombine.low %v1402_v52, %v1403_v34  ;;  %v3176_v15 = vmul.f32 %v3143_v45, %v2676_v21  ;;  %v3180_v2 = vmul.f32 %v3146_v14, %v2684_v63  ;;  %v3930_v31 = vld [vmem:[#allocation24_spill] sm:$0xff]  ;;  %v960_v52 = vld [vmem:[%s3840_s8] sm:$0xf]  ;;  %v3931_v34 = vld [vmem:[#allocation23_spill] sm:$0xff] }
 0x31e   :  { %v3184_v9 = vmul.f32 %v3149_v17, %v2678_v27  ;;  %v3188_v54 = vmul.f32 %v3152_v40, %v3920_v6  ;;  %v3192_v13 = vmul.f32 %v3143_v45, %v3921_v47  ;;  %v3198_v63 = vmul.f32 %v3146_v14, %v3922_v32  ;;  %v3933_v47 = vld [vmem:[#allocation26_spill] sm:$0xff] }
 0x31f   :  { %v1416_v5 = vrot.slane %v1408_v18, %v2497_v55  ;;  %v1423_v21 = vrot.slane %v1409_v20, %v2497_v55  ;;  %v3202_v27 = vmul.f32 %v3149_v17, %v3923_v4  ;;  %v3206_v29 = vmul.f32 %v3152_v40, %v3924_v26  ;;  %v3932_v20 = vld [vmem:[#allocation25_spill] sm:$0xff]  ;;  %v3935_v26 = vld [vmem:[#allocation27_spill] sm:$0xff] }
 0x320   :  { %v3210_v59 = vmul.f32 %v3143_v45, %v3925_v42  ;;  %v3214_v58 = vmul.f32 %v3146_v14, %v3926_v12  ;;  %v3218_v61 = vmul.f32 %v3149_v17, %v3927_v41  ;;  %v3222_v53 = vmul.f32 %v3152_v40, %v3928_v25  ;;  %v3936_v12 = vld [vmem:[#allocation29_spill] sm:$0xff]  ;;  %v3938_v25 = vld [vmem:[#allocation30_spill] sm:$0xff] }
 0x321   :  { %v1424_v39 = vcombine.low %v1416_v5, %v1423_v21  ;;  %v3226_v50 = vmul.f32 %v3143_v45, %v3929_v51  ;;  %v3230_v57 = vmul.f32 %v3146_v14, %v3930_v31  ;;  %v3237_v18 = vmul.f32 %v3149_v17, %v3931_v34  ;;  %v3934_v21 = vld [vmem:[#allocation28_spill] sm:$0xff] }
 0x322   :  { %v3241_v6 = vmul.f32 %v3152_v40, %v3932_v20  ;;  %v3245_v5 = vmul.f32 %v3143_v45, %v3933_v47  ;;  %v3249_v32 = vmul.f32 %v3146_v14, %v3934_v21  ;;  %v3254_v42 = vmul.f32 %v3149_v17, %v3935_v26  ;;  %v3940_v31 = vld [vmem:[#allocation32_spill] sm:$0xff]  ;;  %v3942_v20 = vld [vmem:[#allocation31_spill] sm:$0xff]  ;;  %v3946_v21 = vld [vmem:[#allocation34_spill] sm:$0xff] }
 0x323   :  { %v1431_v4 = vrot.slane %v1424_v39, %v2497_v55  ;;  %v3258_v41 = vmul.f32 %v3152_v40, %v3936_v12  ;;  %v3262_v51 = vmul.f32 %v3143_v45, %v3938_v25  ;;  %v3266_v34 = vmul.f32 %v3146_v14, %v3940_v31  ;;  %v3944_v55 = vld [vmem:[#allocation33_spill] sm:$0xff] }
 0x324   :  { %v3270_v47 = vmul.f32 %v3149_v17, %v3942_v20  ;;  %v3274_v39 = vmul.f32 %v3152_v40, %v3944_v55  ;;  %v3278_v26 = vmul.f32 %v3143_v45, %v3946_v21 }
 0x325   :  { %3937 = vst [vmem:[#allocation13_spill] sm:$0xff] %v3258_v41  ;;  %3939 = vst [vmem:[#allocation14_spill] sm:$0xff] %v3262_v51  ;;  %v1433_v12 = vsub.f32 %v960_v52, %v1431_v4  ;;  %v3947_v41 = vld [vmem:[#allocation36_spill] sm:$0xff]  ;;  %v3948_v51 = vld [vmem:[#allocation35_spill] sm:$0xff] }
 0x326   :  { %3941 = vst [vmem:[#allocation16_spill] sm:$0xff] %v3266_v34  ;;  %3943 = vst [vmem:[#allocation15_spill] sm:$0xff] %v3270_v47  ;;  %v3282_v25 = vmul.f32 %v3146_v14, %v3947_v41  ;;  %v3286_v31 = vmul.f32 %v3149_v17, %v3948_v51  ;;  %v3950_v34 = vld [vmem:[#allocation37_spill] sm:$0xff]  ;;  %v3952_v47 = vld [vmem:[#allocation38_spill] sm:$0xff] }
 0x327   :  { %3945 = vst [vmem:[#allocation17_spill] sm:$0xff] %v3274_v39  ;;  %v3290_v20 = vmul.f32 %v3152_v40, %v3950_v34  ;;  %v3294_v55 = vmul.f32 %v3143_v45, %v3952_v47  ;;  %v3954_v39 = vld [vmem:[#allocation40_spill] sm:$0xff]  ;;  %v3956_v52 = vld [vmem:[#allocation39_spill] sm:$0xff]  ;;  %v3958_v41 = vld [vmem:[#allocation41_spill] sm:$0xff] }
 0x328   :  { %3949 = vst [vmem:[#allocation18_spill] sm:$0xff] %v3286_v31  ;;  %v3298_v21 = vmul.f32 %v3146_v14, %v3954_v39  ;;  %v3302_v4 = vmul.f32 %v3149_v17, %v3956_v52  ;;  %v3306_v51 = vmul.f32 %v3152_v40, %v3958_v41  ;;  %v3960_v31 = vld [vmem:[#allocation42_spill] sm:$0xff] }
 0x329   :  { %3951 = vst [vmem:[#allocation20_spill] sm:$0xff] %v3290_v20  ;;  %3953 = vst [vmem:[#allocation19_spill] sm:$0xff] %v3294_v55  ;;  %v3310_v34 = vmul.f32 %v3143_v45, %v3960_v31  ;;  %v3962_v20 = vld [vmem:[#allocation44_spill] sm:$0xff]  ;;  %v3963_v55 = vld [vmem:[#allocation43_spill] sm:$0xff] }
 0x32a   :  { %3955 = vst [vmem:[#allocation21_spill] sm:$0xff] %v3298_v21  ;;  %3957 = vst [vmem:[#allocation22_spill] sm:$0xff] %v3302_v4  ;;  %v3314_v47 = vmul.f32 %v3146_v14, %v3962_v20  ;;  %v3318_v39 = vmul.f32 %v3149_v17, %v3963_v55  ;;  %v3964_v21 = vld [vmem:[#allocation45_spill] sm:$0xff]  ;;  %v3965_v4 = vld [vmem:[#allocation46_spill] sm:$0xff]  ;;  %v3338_v55 = vmul.f32 %v3152_v40, %v2990_v49 }
 0x32b   :  { %3959 = vst [vmem:[#allocation24_spill] sm:$0xff] %v3306_v51  ;;  %3961 = vst [vmem:[#allocation23_spill] sm:$0xff] %v3310_v34  ;;  %v3322_v52 = vmul.f32 %v3152_v40, %v3964_v21  ;;  %v3326_v41 = vmul.f32 %v3143_v45, %v3965_v4  ;;  %v3966_v51 = vld [vmem:[#allocation48_spill] sm:$0xff]  ;;  %v3967_v34 = vld [vmem:[#allocation47_spill] sm:$0xff]  ;;  %v3342_v21 = vmul.f32 %v3143_v45, %v3004_v3 }
 0x32c   :  { %v3330_v31 = vmul.f32 %v3146_v14, %v3966_v51  ;;  %v3334_v20 = vmul.f32 %v3149_v17, %v3967_v34  ;;  %v3346_v4 = vmul.f32 %v3146_v14, %v3008_v24  ;;  %v3350_v51 = vmul.f32 %v3149_v17, %v3006_v33 }
 0x32d   :  { %v3354_v34 = vmul.f32 %v3152_v40, %v3010_v28  ;;  %v3358_v49 = vmul.f32 %v3143_v45, %v3040_v19  ;;  %v3362_v3 = vmul.f32 %v3146_v14, %v3044_v30  ;;  %v3366_v24 = vmul.f32 %v3149_v17, %v3042_v46 }
 0x32e   :  { %v3370_v33 = vmul.f32 %v3143_v45, %v3060_v0  ;;  %v3374_v28 = vmul.f32 %v3146_v14, %v3064_v22  ;;  %v3378_v19 = vmul.f32 %v3149_v17, %v3062_v56  ;;  %v3382_v30 = vmul.f32 %v3152_v40, %v3066_v37 }
 0x32f   :  { %v3386_v46 = vmul.f32 %v3143_v45, %v3096_v23  ;;  %v3390_v0 = vmul.f32 %v3146_v14, %v3100_v16  ;;  %v3394_v22 = vmul.f32 %v3149_v17, %v3098_v36  ;;  %v3398_v56 = vmul.f32 %v3152_v40, %v3102_v10  ;;  %v3972_v10 = vld [vmem:[#allocation49_spill] sm:$0xff] }
 0x330   :  { %v3402_v37 = vmul.f32 %v3143_v45, %v3116_v11  ;;  %v3406_v23 = vmul.f32 %v3146_v14, %v3120_v62  ;;  %v3410_v16 = vmul.f32 %v3149_v17, %v3118_v7  ;;  %v3422_v11 = vrot.slane %v1433_v12, %v2284_v38 }
 0x331   :  { %3968 = vst [vmem:[#allocation25_spill] sm:$0xff] %v3390_v0  ;;  %3969 = vst [vmem:[#allocation26_spill] sm:$0xff] %v3394_v22  ;;  %v3971_v0 = vld [vmem:[#allocation50_spill] sm:$0xff]  ;;  %v3417_v22 = vrot.slane %v1433_v12, %v2278_v35  ;;  %v3425_v62 = vrot.slane %v1433_v12, %v2636_v1  ;;  %v3428_v45 = vrot.slane %v1433_v12, %v2642_v8  ;;  %v3977_v12 = vld [vmem:[#allocation15_spill] sm:$0xff] }
 0x332   :  { %3970 = vst [vmem:[#allocation28_spill] sm:$0xff] %v3398_v56  ;;  %v3414_v36 = vmul.f32 %v3152_v40, %v3971_v0  ;;  %v1485_v56 = vmul.f32 %v3152_v40, %v3972_v10  ;;  %v3448_v1 = vadd.f32 %v3422_v11, %v3164_v44  ;;  %v1524_v40 = vadd.f32 %v3422_v11, %v3180_v2  ;;  %v3979_v0 = vld [vmem:[#allocation17_spill] sm:$0xff] }
 0x333   :  { %v3432_v7 = vadd.f32 %v3417_v22, %v3160_v43  ;;  %v3436_v35 = vadd.f32 %v3417_v22, %v3176_v15  ;;  %v3440_v14 = vadd.f32 %v3417_v22, %v3192_v13  ;;  %v3444_v38 = vadd.f32 %v3417_v22, %v3210_v59 }
 0x334   :  { %v3452_v8 = vadd.f32 %v3425_v62, %v3168_v60  ;;  %v3456_v17 = vadd.f32 %v3428_v45, %v3172_v48  ;;  %v3462_v43 = vadd.f32 %v3425_v62, %v3184_v9  ;;  %v1526_v15 = vadd.f32 %v3428_v45, %v3188_v54 }
 0x335   :  { %v3468_v44 = vadd.f32 %v3422_v11, %v3198_v63  ;;  %v3472_v60 = vadd.f32 %v3425_v62, %v3202_v27  ;;  %v3476_v48 = vadd.f32 %v3428_v45, %v3206_v29  ;;  %v3480_v2 = vadd.f32 %v3422_v11, %v3214_v58 }
 0x336   :  { %v3484_v9 = vadd.f32 %v3425_v62, %v3218_v61  ;;  %v3488_v54 = vadd.f32 %v3428_v45, %v3222_v53  ;;  %v3492_v13 = vadd.f32 %v3417_v22, %v3226_v50  ;;  %v3496_v63 = vadd.f32 %v3422_v11, %v3230_v57  ;;  %v3973_v53 = vld [vmem:[#allocation13_spill] sm:$0xff]  ;;  %v3974_v57 = vld [vmem:[#allocation14_spill] sm:$0xff] }
 0x337   :  { %v3500_v27 = vadd.f32 %v3425_v62, %v3237_v18  ;;  %v3504_v29 = vadd.f32 %v3428_v45, %v3241_v6  ;;  %v3508_v59 = vadd.f32 %v3417_v22, %v3245_v5  ;;  %v3512_v58 = vadd.f32 %v3422_v11, %v3249_v32  ;;  %v3976_v6 = vld [vmem:[#allocation16_spill] sm:$0xff] }
 0x338   :  { %v3516_v61 = vadd.f32 %v3425_v62, %v3254_v42  ;;  %v3520_v50 = vadd.f32 %v3428_v45, %v3973_v53  ;;  %v3524_v18 = vadd.f32 %v3417_v22, %v3974_v57  ;;  %v3528_v5 = vadd.f32 %v3422_v11, %v3976_v6  ;;  %v3983_v57 = vld [vmem:[#allocation18_spill] sm:$0xff] }
 0x339   :  { %v3532_v32 = vadd.f32 %v3425_v62, %v3977_v12  ;;  %v3536_v42 = vadd.f32 %v3428_v45, %v3979_v0  ;;  %v3540_v10 = vadd.f32 %v3417_v22, %v3278_v26  ;;  %v3544_v53 = vadd.f32 %v3422_v11, %v3282_v25 }
 0x33a   :  { %3975 = vst [vmem:[#allocation27_spill] sm:$0xff] %v3524_v18  ;;  %v3548_v6 = vadd.f32 %v3425_v62, %v3983_v57  ;;  %v3985_v18 = vld [vmem:[#allocation20_spill] sm:$0xff] }
 0x33b   :  { %3978 = vst [vmem:[#allocation29_spill] sm:$0xff] %v3532_v32  ;;  %3980 = vst [vmem:[#allocation30_spill] sm:$0xff] %v3536_v42  ;;  %v3552_v12 = vadd.f32 %v3428_v45, %v3985_v18  ;;  %v3986_v32 = vld [vmem:[#allocation19_spill] sm:$0xff]  ;;  %v3987_v42 = vld [vmem:[#allocation21_spill] sm:$0xff] }
 0x33c   :  { %3981 = vst [vmem:[#allocation32_spill] sm:$0xff] %v3540_v10  ;;  %3982 = vst [vmem:[#allocation31_spill] sm:$0xff] %v3544_v53  ;;  %v3556_v0 = vadd.f32 %v3417_v22, %v3986_v32  ;;  %v3560_v26 = vadd.f32 %v3422_v11, %v3987_v42  ;;  %v3988_v10 = vld [vmem:[#allocation22_spill] sm:$0xff]  ;;  %v3989_v53 = vld [vmem:[#allocation24_spill] sm:$0xff]  ;;  %v3576_v32 = vadd.f32 %v3422_v11, %v3314_v47 }
 0x33d   :  { %3984 = vst [vmem:[#allocation33_spill] sm:$0xff] %v3548_v6  ;;  %v3564_v25 = vadd.f32 %v3425_v62, %v3988_v10  ;;  %v3568_v57 = vadd.f32 %v3428_v45, %v3989_v53  ;;  %v3990_v6 = vld [vmem:[#allocation23_spill] sm:$0xff]  ;;  %v3580_v42 = vadd.f32 %v3425_v62, %v3318_v39  ;;  %v3584_v10 = vadd.f32 %v3428_v45, %v3322_v52 }
 0x33e   :  { %v3572_v18 = vadd.f32 %v3417_v22, %v3990_v6  ;;  %v3588_v53 = vadd.f32 %v3417_v22, %v3326_v41  ;;  %v3592_v6 = vadd.f32 %v3422_v11, %v3330_v31  ;;  %v3596_v47 = vadd.f32 %v3425_v62, %v3334_v20 }
 0x33f   :  { %v3600_v39 = vadd.f32 %v3428_v45, %v3338_v55  ;;  %v3604_v52 = vadd.f32 %v3417_v22, %v3342_v21  ;;  %v3608_v41 = vadd.f32 %v3422_v11, %v3346_v4  ;;  %v3612_v31 = vadd.f32 %v3425_v62, %v3350_v51 }
 0x340   :  { %3991 = vst [vmem:[#allocation34_spill] sm:$0xff] %v3596_v47  ;;  %v3616_v20 = vadd.f32 %v3428_v45, %v3354_v34  ;;  %v3620_v55 = vadd.f32 %v3417_v22, %v3358_v49  ;;  %v3624_v21 = vadd.f32 %v3422_v11, %v3362_v3  ;;  %v3628_v4 = vadd.f32 %v3425_v62, %v3366_v24 }
 0x341   :  { %v3631_v47 = vadd.f32 %v3428_v45, %v1485_v56  ;;  %v3635_v51 = vadd.f32 %v3417_v22, %v3370_v33  ;;  %v3639_v34 = vadd.f32 %v3422_v11, %v3374_v28  ;;  %v3643_v49 = vadd.f32 %v3425_v62, %v3378_v19  ;;  %v3997_v56 = vld [vmem:[#allocation25_spill] sm:$0xff] }
 0x342   :  { %3992 = vst [vmem:[#allocation36_spill] sm:$0xff] %v3620_v55  ;;  %3993 = vst [vmem:[#allocation35_spill] sm:$0xff] %v3628_v4  ;;  %v3647_v3 = vadd.f32 %v3428_v45, %v3382_v30  ;;  %v3651_v24 = vadd.f32 %v3417_v22, %v3386_v46  ;;  %v3655_v33 = vadd.f32 %v3422_v11, %v3997_v56  ;;  %v3999_v4 = vld [vmem:[#allocation26_spill] sm:$0xff] }
 0x343   :  { %3994 = vst [vmem:[#allocation37_spill] sm:$0xff] %v3635_v51  ;;  %3995 = vst [vmem:[#allocation38_spill] sm:$0xff] %v3643_v49  ;;  %v3659_v28 = vadd.f32 %v3425_v62, %v3999_v4  ;;  %v4001_v51 = vld [vmem:[#allocation28_spill] sm:$0xff]  ;;  %v3667_v30 = vadd.f32 %v3417_v22, %v3402_v37  ;;  %v3671_v46 = vadd.f32 %v3422_v11, %v3406_v23 }
 0x344   :  { %3996 = vst [vmem:[#allocation40_spill] sm:$0xff] %v3651_v24  ;;  %3998 = vst [vmem:[#allocation39_spill] sm:$0xff] %v3655_v33  ;;  %v3663_v19 = vadd.f32 %v3428_v45, %v4001_v51  ;;  %v3675_v56 = vadd.f32 %v3425_v62, %v3410_v16  ;;  %v3679_v4 = vadd.f32 %v3428_v45, %v3414_v36 }
 0x345   :  { %4000 = vst [vmem:[#allocation41_spill] sm:$0xff] %v3659_v28  ;;  %4003 = vst [vmem:[#allocation44_spill] sm:$0xff] %v3667_v30 }
 0x346   :  { %4002 = vst [vmem:[#allocation42_spill] sm:$0xff] %v3663_v19  ;;  %4004 = vst [vmem:[#allocation43_spill] sm:$0xff] %v3671_v46 }
 0x347   :  { %4005 = vst [vmem:[#allocation45_spill] sm:$0xff] %v3675_v56  ;;  %4006 = vst [vmem:[#allocation46_spill] sm:$0xff] %v3679_v4 }
 0x348   :  { %2110 = dma.done.wait [#allocation4 + $0x1], 4096 }
 0x349   :  { %2111 = vsyncadd [#allocation4 + $0x1], 4294963200  ;;  %v1588_v51 = vpack.c.bf16 %v1524_v40, %v3448_v1  ;;  %v1590_v28 = vpack.c.bf16 %v1526_v15, %v3456_v17  ;;  %v1627_v22 = vld [vmem:[#allocation3 + $0x40] sm:$0xff]  ;;  %v1628_v11 = vld [vmem:[#allocation3 + $0x48] sm:$0xff]  ;;  %v1589_v55 = vpack.c.bf16 %v3462_v43, %v3452_v8  ;;  %v1596_v8 = vpack.c.bf16 %v3512_v58, %v3496_v63 }
 0x34a   :  { %v1619_v37 = vld [vmem:[#allocation3] sm:$0xff]  ;;  %1906 = vmatprep.subr.bf16.mxu1 %v1627_v22  ;;  %v3689_v36 = vld [vmem:[#allocation3 + $0xc8] sm:$0xff]  ;;  %v1629_v1 = vld [vmem:[#allocation3 + $0x50] sm:$0xff]  ;;  %v1598_v43 = vpack.c.bf16 %v3520_v50, %v3504_v29  ;;  %v1606_v58 = vpack.c.bf16 %v3584_v10, %v3568_v57  ;;  %v1605_v50 = vpack.c.bf16 %v3580_v42, %v3564_v25  ;;  %v1612_v25 = vpack.c.bf16 %v3639_v34, %v3624_v21 }
 0x34b   :  { %1690 = vmatprep.mubr.bf16.mxu1 %v1588_v51  ;;  %1787 = vmatprep.mubr.bf16.mxu0 %v1590_v28  ;;  %v3683_v23 = vld [vmem:[#allocation3 + $0xc0] sm:$0xff]  ;;  %v1620_v62 = vld [vmem:[#allocation3 + $0x8] sm:$0xff]  ;;  %v3694_v17 = vld [vmem:[#allocation3 + $0xd0] sm:$0xff] }
 0x34c   :  { %1970 = vmatprep.subr.bf16.mxu0 %v3683_v23  ;;  %v3686_v16 = vld [vmem:[#allocation3 + $0x80] sm:$0xff]  ;;  %1907 = vmatpush3.bf16.msra.mxu1 %v1619_v37  ;;  %v3692_v45 = vld [vmem:[#allocation3 + $0x88] sm:$0xff]  ;;  %v1621_v40 = vld [vmem:[#allocation3 + $0x10] sm:$0xff] }
 0x34d   :  { %1971 = vmatpush3.bf16.msra.mxu0 %v3686_v16  ;;  %1908 = vmatprep.subr.bf16.mxu1 %v1628_v11  ;;  %v1637_v15 = vld [vmem:[#allocation3 + $0x90] sm:$0xff]  ;;  %v1630_v28 = vld [vmem:[#allocation3 + $0x58] sm:$0xff]  ;;  %v1631_v11 = vld [vmem:[#allocation3 + $0x60] sm:$0xff] }
 0x34e   :  { %1972 = vmatprep.subr.bf16.mxu0 %v3689_v36  ;;  %v1646_v51 = vld [vmem:[#allocation3 + $0xd8] sm:$0xff]  ;;  %v1647_v56 = vld [vmem:[#allocation3 + $0xe0] sm:$0xff]  ;;  %v1632_v4 = vld [vmem:[#allocation3 + $0x68] sm:$0xff] }
 0x34f   :  { %v1622_v22 = vld [vmem:[#allocation3 + $0x18] sm:$0xff]  ;;  %v1648_v19 = vld [vmem:[#allocation3 + $0xe8] sm:$0xff]  ;;  %v1649_v24 = vld [vmem:[#allocation3 + $0xf0] sm:$0xff] }
 0x350   :  { %1909 = vmatpush3.bf16.msra.mxu1 %v1620_v62  ;;  %v1638_v37 = vld [vmem:[#allocation3 + $0x98] sm:$0xff]  ;;  %v1623_v62 = vld [vmem:[#allocation3 + $0x20] sm:$0xff]  ;;  %v1624_v30 = vld [vmem:[#allocation3 + $0x28] sm:$0xff] }
 0x351   :  { %1973 = vmatpush3.bf16.msra.mxu0 %v3692_v45  ;;  %1910 = vmatprep.subr.bf16.mxu1 %v1629_v1  ;;  %v1639_v1 = vld [vmem:[#allocation3 + $0xa0] sm:$0xff]  ;;  %v1625_v46 = vld [vmem:[#allocation3 + $0x30] sm:$0xff]  ;;  %v1650_v33 = vld [vmem:[#allocation3 + $0xf8] sm:$0xff] }
 0x352   :  { %1974 = vmatprep.subr.bf16.mxu0 %v3694_v17  ;;  %v1626_v49 = vld [vmem:[#allocation3 + $0x38] sm:$0xff]  ;;  %v4011_v63 = vld [vmem:[#allocation29_spill] sm:$0xff]  ;;  %v4013_v57 = vld [vmem:[#allocation34_spill] sm:$0xff] }
 0x353   :  { %v4012_v29 = vld [vmem:[#allocation33_spill] sm:$0xff]  ;;  %v4023_v34 = vld [vmem:[#allocation46_spill] sm:$0xff] }
 0x354   :  { %1911 = vmatpush3.bf16.msra.mxu1 %v1621_v40  ;;  %v1640_v40 = vld [vmem:[#allocation3 + $0xa8] sm:$0xff]  ;;  %v4015_v42 = vld [vmem:[#allocation37_spill] sm:$0xff] }
 0x355   :  { %1975 = vmatpush3.bf16.msra.mxu0 %v1637_v15  ;;  %1912 = vmatprep.subr.bf16.mxu1 %v1630_v28  ;;  %v1633_v28 = vld [vmem:[#allocation3 + $0x70] sm:$0xff] }
 0x356   :  { %1976 = vmatprep.subr.bf16.mxu0 %v1646_v51 }
 0x358   :  { %1913 = vmatpush3.bf16.msra.mxu1 %v1622_v22  ;;  %v1641_v22 = vld [vmem:[#allocation3 + $0xb0] sm:$0xff] }
 0x359   :  { %1977 = vmatpush3.bf16.msra.mxu0 %v1638_v37  ;;  %1914 = vmatprep.subr.bf16.mxu1 %v1631_v11  ;;  %v1634_v11 = vld [vmem:[#allocation3 + $0x78] sm:$0xff] }
 0x35a   :  { %1978 = vmatprep.subr.bf16.mxu0 %v1647_v56 }
 0x35c   :  { %1915 = vmatpush3.bf16.msra.mxu1 %v1623_v62  ;;  %v1642_v62 = vld [vmem:[#allocation3 + $0xb8] sm:$0xff] }
 0x35d   :  { %1979 = vmatpush3.bf16.msra.mxu0 %v1639_v1  ;;  %1916 = vmatprep.subr.bf16.mxu1 %v1632_v4  ;;  %v1587_v4 = vpack.c.bf16 %v3436_v35, %v3432_v7  ;;  %v1591_v7 = vpack.c.bf16 %v3444_v38, %v3440_v14  ;;  %v1593_v35 = vpack.c.bf16 %v3484_v9, %v3472_v60  ;;  %v4009_v9 = vld [vmem:[#allocation27_spill] sm:$0xff] }
 0x35e   :  { %1980 = vmatprep.subr.bf16.mxu0 %v1648_v19  ;;  %v1595_v14 = vpack.c.bf16 %v3508_v59, %v3492_v13  ;;  %v1597_v38 = vpack.c.bf16 %v3516_v61, %v3500_v27  ;;  %v1601_v27 = vpack.c.bf16 %v4012_v29, %v4011_v63  ;;  %v1604_v59 = vpack.c.bf16 %v3576_v32, %v3560_v26  ;;  %v4014_v32 = vld [vmem:[#allocation36_spill] sm:$0xff] }
 0x35f   :  { %v1603_v61 = vpack.c.bf16 %v3572_v18, %v3556_v0  ;;  %v1607_v26 = vpack.c.bf16 %v3604_v52, %v3588_v53  ;;  %v1609_v0 = vpack.c.bf16 %v3612_v31, %v4013_v57  ;;  %v1614_v18 = vpack.c.bf16 %v3647_v3, %v3631_v47  ;;  %v4018_v53 = vld [vmem:[#allocation39_spill] sm:$0xff]  ;;  %v4020_v31 = vld [vmem:[#allocation40_spill] sm:$0xff]  ;;  %v4022_v47 = vld [vmem:[#allocation42_spill] sm:$0xff] }
 0x360   :  { %1917 = vmatpush3.bf16.msra.mxu1 %v1624_v30  ;;  %v1592_v30 = vpack.c.bf16 %v3480_v2, %v3468_v44  ;;  %v4007_v44 = vld [vmem:[#allocation31_spill] sm:$0xff]  ;;  %v1611_v10 = vpack.c.bf16 %v4015_v42, %v4014_v32  ;;  %v4024_v3 = vld [vmem:[#allocation41_spill] sm:$0xff] }
 0x361   :  { %1981 = vmatpush3.bf16.msra.mxu0 %v1640_v40  ;;  %1918 = vmatprep.subr.bf16.mxu1 %v1633_v28  ;;  %v1600_v60 = vpack.c.bf16 %v4007_v44, %v3528_v5  ;;  %v1608_v5 = vpack.c.bf16 %v3608_v41, %v3592_v6  ;;  %v4016_v6 = vld [vmem:[#allocation35_spill] sm:$0xff] }
 0x362   :  { %1982 = vmatprep.subr.bf16.mxu0 %v1649_v24  ;;  %v4019_v52 = vld [vmem:[#allocation43_spill] sm:$0xff] }
 0x364   :  { %1919 = vmatpush3.bf16.msra.mxu1 %v1625_v46  ;;  %v1594_v46 = vpack.c.bf16 %v3488_v54, %v3476_v48  ;;  %v4008_v48 = vld [vmem:[#allocation30_spill] sm:$0xff]  ;;  %v4010_v54 = vld [vmem:[#allocation32_spill] sm:$0xff] }
 0x365   :  { %1983 = vmatpush3.bf16.msra.mxu0 %v1641_v22  ;;  %1920 = vmatprep.subr.bf16.mxu1 %v1634_v11  ;;  %v1602_v2 = vpack.c.bf16 %v3552_v12, %v4008_v48  ;;  %v1599_v13 = vpack.c.bf16 %v4010_v54, %v4009_v9  ;;  %v1610_v12 = vpack.c.bf16 %v3616_v20, %v3600_v39  ;;  %v4017_v39 = vld [vmem:[#allocation38_spill] sm:$0xff] }
 0x366   :  { %1984 = vmatprep.subr.bf16.mxu0 %v1650_v33  ;;  %v1613_v41 = vpack.c.bf16 %v4017_v39, %v4016_v6  ;;  %v1616_v20 = vpack.c.bf16 %v4019_v52, %v4018_v53 }
 0x368   :  { %1921 = vmatpush3.bf16.msra.mxu1 %v1626_v49  ;;  %v1618_v49 = vpack.c.bf16 %v4023_v34, %v4022_v47 }
 0x369   :  { %1985 = vmatpush3.bf16.msra.mxu0 %v1642_v62  ;;  %2034 = vmatprep.subr.bf16.mxu1 %v3683_v23  ;;  %v3766_v23 = vld [vmem:[%s3842_s10] ss:$0 sm:$0xff] }
 0x36b   :  { %1691 = vmatmul.mubr.bf16.vlgmr.msra.gmra.mrb[32].mxu1 %v1587_v4 }
 0x36c   :  { %1788 = vmatmul.mubr.bf16.vlgmr.msra.gmra.mrb[64].mxu0 %v1589_v55  ;;  %2042 = vmatpush3.bf16.msra.mxu1 %v3686_v16  ;;  %v4021_v55 = vld [vmem:[#allocation44_spill] sm:$0xff] }
 0x36d   :  { %1698 = vmatprep.mubr.bf16.mxu1 %v1592_v30  ;;  %2035 = vmatprep.subr.bf16.mxu1 %v3689_v36  ;;  %v1615_v21 = vpack.c.bf16 %v4021_v55, %v4020_v31 }
 0x36e   :  { %1795 = vmatprep.mubr.bf16.mxu0 %v1594_v46 }
 0x370   :  { %2043 = vmatpush3.bf16.msra.mxu1 %v3692_v45 }
 0x371   :  { %2036 = vmatprep.subr.bf16.mxu1 %v3694_v17 }
 0x373   :  { %1699 = vmatmul.mubr.bf16.gmra.mrb[36].mxu1 %v1591_v7 }
 0x374   :  { %1796 = vmatmul.mubr.bf16.gmra.mrb[68].mxu0 %v1593_v35  ;;  %1706 = vmatprep.mubr.bf16.mxu1 %v1596_v8 }
 0x375   :  { %2044 = vmatpush3.bf16.msra.mxu1 %v1637_v15  ;;  %1803 = vmatprep.mubr.bf16.mxu0 %v1598_v43 }
 0x376   :  { %2037 = vmatprep.subr.bf16.mxu1 %v1646_v51 }
 0x379   :  { %2045 = vmatpush3.bf16.msra.mxu1 %v1638_v37 }
 0x37a   :  { %2038 = vmatprep.subr.bf16.mxu1 %v1647_v56 }
 0x37b   :  { %1707 = vmatmul.mubr.bf16.gmra.mrb[40].mxu1 %v1595_v14 }
 0x37c   :  { %1804 = vmatmul.mubr.bf16.gmra.mrb[72].mxu0 %v1597_v38  ;;  %1714 = vmatprep.mubr.bf16.mxu1 %v1600_v60 }
 0x37d   :  { %1811 = vmatprep.mubr.bf16.mxu0 %v1602_v2  ;;  %2046 = vmatpush3.bf16.msra.mxu1 %v1639_v1 }
 0x37e   :  { %2039 = vmatprep.subr.bf16.mxu1 %v1648_v19 }
 0x381   :  { %2047 = vmatpush3.bf16.msra.mxu1 %v1640_v40 }
 0x382   :  { %2040 = vmatprep.subr.bf16.mxu1 %v1649_v24  ;;  %v4025_v24 = vld [vmem:[#allocation45_spill] sm:$0xff] }
 0x383   :  { %1715 = vmatmul.mubr.bf16.gmra.mrb[44].mxu1 %v1599_v13 }
 0x384   :  { %1812 = vmatmul.mubr.bf16.gmra.mrb[76].mxu0 %v1601_v27  ;;  %1722 = vmatprep.mubr.bf16.mxu1 %v1604_v59 }
 0x385   :  { %1819 = vmatprep.mubr.bf16.mxu0 %v1606_v58  ;;  %2048 = vmatpush3.bf16.msra.mxu1 %v1641_v22 }
 0x386   :  { %2041 = vmatprep.subr.bf16.mxu1 %v1650_v33  ;;  %v1617_v33 = vpack.c.bf16 %v4025_v24, %v4024_v3 }
 0x389   :  { %2049 = vmatpush3.bf16.msra.mxu1 %v1642_v62 }
 0x38b   :  { %1723 = vmatmul.mubr.bf16.gmra.mrb[48].mxu1 %v1603_v61 }
 0x38c   :  { %1820 = vmatmul.mubr.bf16.gmra.mrb[80].mxu0 %v1605_v50  ;;  %1730 = vmatprep.mubr.bf16.mxu1 %v1608_v5 }
 0x38d   :  { %1827 = vmatprep.mubr.bf16.mxu0 %v1610_v12 }
 0x393   :  { %1731 = vmatmul.mubr.bf16.gmra.mrb[52].mxu1 %v1607_v26 }
 0x394   :  { %1828 = vmatmul.mubr.bf16.gmra.mrb[84].mxu0 %v1609_v0  ;;  %1738 = vmatprep.mubr.bf16.mxu1 %v1612_v25 }
 0x395   :  { %1835 = vmatprep.mubr.bf16.mxu0 %v1614_v18 }
 0x39b   :  { %1739 = vmatmul.mubr.bf16.gmra.mrb[56].mxu1 %v1611_v10 }
 0x39c   :  { %1836 = vmatmul.mubr.bf16.gmra.mrb[88].mxu0 %v1613_v41  ;;  %1746 = vmatprep.mubr.bf16.mxu1 %v1616_v20 }
 0x3a3   :  { %1747 = vmatmul.mubr.bf16.gmra.mrb[60].mxu1 %v1615_v21 }
 0x3a4   :  { %1843 = vmatprep.mubr.bf16.mxu1 %v1618_v49 }
 0x3ab   :  { %1844 = vmatmul.mubr.bf16.vlgmr.msra.gmra.mrb[64].mxu1 %v1617_v33 }
 0x43e   :  { %v1922_v19 = vpop.f32.mrb[32].mxu1 }
 0x43f   :  { %v1986_v56 = vpop.f32.mrb[64].mxu0  ;;  %v1923_v16 = vpop.f32.mrb[33].mxu1 }
 0x440   :  { %v1987_v36 = vpop.f32.mrb[65].mxu0  ;;  %v1924_v45 = vadd.f32 %v1923_v16, %v1922_v19  ;;  %v1925_v17 = vpop.f32.mrb[34].mxu1 }
 0x441   :  { %v1988_v15 = vadd.f32 %v1987_v36, %v1986_v56  ;;  %v1989_v51 = vpop.f32.mrb[66].mxu0  ;;  %v1926_v37 = vpop.f32.mrb[35].mxu1 }
 0x442   :  { %v1990_v1 = vpop.f32.mrb[67].mxu0  ;;  %v1693_v40 = vadd.f32 %v1924_v45, %v3766_v23  ;;  %v1927_v28 = vadd.f32 %v1926_v37, %v1925_v17 }
 0x443   :  { %v1991_v22 = vadd.f32 %v1990_v1, %v1989_v51 }
 0x444   :  { %v1696_v11 = vadd.f32 %v1927_v28, %v3766_v23  ;;  %v1790_v62 = vadd.f32 %v1988_v15, %v1693_v40 }
 0x446   :  { %1852 = vst [vmem:[%s3843_s11] sm:$0xff] %v1790_v62  ;;  %v1793_v4 = vadd.f32 %v1991_v22, %v1696_v11  ;;  %v1928_v30 = vpop.f32.mrb[36].mxu1 }
 0x447   :  { %v1992_v46 = vpop.f32.mrb[68].mxu0  ;;  %v1929_v7 = vpop.f32.mrb[37].mxu1 }
 0x448   :  { %v1993_v35 = vpop.f32.mrb[69].mxu0  ;;  %1853 = vst [vmem:[%s3843_s11 + $0x8] sm:$0xff] %v1793_v4  ;;  %v1930_v8 = vadd.f32 %v1929_v7, %v1928_v30  ;;  %v1931_v43 = vpop.f32.mrb[38].mxu1 }
 0x449   :  { %v1994_v14 = vadd.f32 %v1993_v35, %v1992_v46  ;;  %v1995_v38 = vpop.f32.mrb[70].mxu0  ;;  %v1932_v44 = vpop.f32.mrb[39].mxu1 }
 0x44a   :  { %v1996_v60 = vpop.f32.mrb[71].mxu0  ;;  %v1701_v48 = vadd.f32 %v1930_v8, %v3766_v23  ;;  %v1933_v2 = vadd.f32 %v1932_v44, %v1931_v43 }
 0x44b   :  { %v1997_v9 = vadd.f32 %v1996_v60, %v1995_v38 }
 0x44c   :  { %v1704_v54 = vadd.f32 %v1933_v2, %v3766_v23  ;;  %v1798_v13 = vadd.f32 %v1994_v14, %v1701_v48 }
 0x44e   :  { %1854 = vst [vmem:[%s3843_s11 + $0x10] sm:$0xff] %v1798_v13  ;;  %v1801_v63 = vadd.f32 %v1997_v9, %v1704_v54  ;;  %v1934_v29 = vpop.f32.mrb[40].mxu1 }
 0x44f   :  { %v1998_v27 = vpop.f32.mrb[72].mxu0  ;;  %v1935_v59 = vpop.f32.mrb[41].mxu1 }
 0x450   :  { %v1999_v58 = vpop.f32.mrb[73].mxu0  ;;  %1855 = vst [vmem:[%s3843_s11 + $0x18] sm:$0xff] %v1801_v63  ;;  %v1936_v61 = vadd.f32 %v1935_v59, %v1934_v29  ;;  %v1937_v50 = vpop.f32.mrb[42].mxu1 }
 0x451   :  { %v2000_v5 = vadd.f32 %v1999_v58, %v1998_v27  ;;  %v2001_v12 = vpop.f32.mrb[74].mxu0  ;;  %v1938_v26 = vpop.f32.mrb[43].mxu1 }
 0x452   :  { %v2002_v57 = vpop.f32.mrb[75].mxu0  ;;  %v1709_v0 = vadd.f32 %v1936_v61, %v3766_v23  ;;  %v1939_v25 = vadd.f32 %v1938_v26, %v1937_v50 }
 0x453   :  { %v2003_v18 = vadd.f32 %v2002_v57, %v2001_v12 }
 0x454   :  { %v1712_v32 = vadd.f32 %v1939_v25, %v3766_v23  ;;  %v1806_v42 = vadd.f32 %v2000_v5, %v1709_v0 }
 0x456   :  { %1856 = vst [vmem:[%s3843_s11 + $0x20] sm:$0xff] %v1806_v42  ;;  %v1809_v10 = vadd.f32 %v2003_v18, %v1712_v32  ;;  %v1940_v6 = vpop.f32.mrb[44].mxu1 }
 0x457   :  { %v2004_v39 = vpop.f32.mrb[76].mxu0  ;;  %v1941_v41 = vpop.f32.mrb[45].mxu1 }
 0x458   :  { %v2005_v53 = vpop.f32.mrb[77].mxu0  ;;  %1857 = vst [vmem:[%s3843_s11 + $0x28] sm:$0xff] %v1809_v10  ;;  %v1942_v52 = vadd.f32 %v1941_v41, %v1940_v6  ;;  %v1943_v20 = vpop.f32.mrb[46].mxu1 }
 0x459   :  { %v2006_v31 = vadd.f32 %v2005_v53, %v2004_v39  ;;  %v2007_v55 = vpop.f32.mrb[78].mxu0  ;;  %v1944_v21 = vpop.f32.mrb[47].mxu1 }
 0x45a   :  { %v2008_v47 = vpop.f32.mrb[79].mxu0  ;;  %v1717_v34 = vadd.f32 %v1942_v52, %v3766_v23  ;;  %v1945_v49 = vadd.f32 %v1944_v21, %v1943_v20 }
 0x45b   :  { %v2009_v3 = vadd.f32 %v2008_v47, %v2007_v55 }
 0x45c   :  { %v1720_v24 = vadd.f32 %v1945_v49, %v3766_v23  ;;  %v1814_v33 = vadd.f32 %v2006_v31, %v1717_v34 }
 0x45e   :  { %1858 = vst [vmem:[%s3843_s11 + $0x30] sm:$0xff] %v1814_v33  ;;  %v1817_v19 = vadd.f32 %v2009_v3, %v1720_v24  ;;  %v1946_v56 = vpop.f32.mrb[48].mxu1 }
 0x45f   :  { %v2010_v16 = vpop.f32.mrb[80].mxu0  ;;  %v1947_v36 = vpop.f32.mrb[49].mxu1 }
 0x460   :  { %v2011_v45 = vpop.f32.mrb[81].mxu0  ;;  %1859 = vst [vmem:[%s3843_s11 + $0x38] sm:$0xff] %v1817_v19  ;;  %v1948_v17 = vadd.f32 %v1947_v36, %v1946_v56  ;;  %v1949_v15 = vpop.f32.mrb[50].mxu1 }
 0x461   :  { %v2012_v51 = vadd.f32 %v2011_v45, %v2010_v16  ;;  %v2013_v37 = vpop.f32.mrb[82].mxu0  ;;  %v1950_v1 = vpop.f32.mrb[51].mxu1 }
 0x462   :  { %v2014_v40 = vpop.f32.mrb[83].mxu0  ;;  %v1725_v28 = vadd.f32 %v1948_v17, %v3766_v23  ;;  %v1951_v22 = vadd.f32 %v1950_v1, %v1949_v15 }
 0x463   :  { %v2015_v11 = vadd.f32 %v2014_v40, %v2013_v37 }
 0x464   :  { %v1728_v62 = vadd.f32 %v1951_v22, %v3766_v23  ;;  %v1822_v4 = vadd.f32 %v2012_v51, %v1725_v28 }
 0x466   :  { %1860 = vst [vmem:[%s3843_s11 + $0x40] sm:$0xff] %v1822_v4  ;;  %v1825_v30 = vadd.f32 %v2015_v11, %v1728_v62  ;;  %v1952_v46 = vpop.f32.mrb[52].mxu1 }
 0x467   :  { %v2016_v7 = vpop.f32.mrb[84].mxu0  ;;  %v1953_v35 = vpop.f32.mrb[53].mxu1 }
 0x468   :  { %v2017_v8 = vpop.f32.mrb[85].mxu0  ;;  %1861 = vst [vmem:[%s3843_s11 + $0x48] sm:$0xff] %v1825_v30  ;;  %v1954_v43 = vadd.f32 %v1953_v35, %v1952_v46  ;;  %v1955_v14 = vpop.f32.mrb[54].mxu1 }
 0x469   :  { %v2018_v38 = vadd.f32 %v2017_v8, %v2016_v7  ;;  %v2019_v44 = vpop.f32.mrb[86].mxu0  ;;  %v1956_v60 = vpop.f32.mrb[55].mxu1 }
 0x46a   :  { %v2020_v48 = vpop.f32.mrb[87].mxu0  ;;  %v1733_v2 = vadd.f32 %v1954_v43, %v3766_v23  ;;  %v1957_v9 = vadd.f32 %v1956_v60, %v1955_v14 }
 0x46b   :  { %v2021_v54 = vadd.f32 %v2020_v48, %v2019_v44 }
 0x46c   :  { %v1736_v13 = vadd.f32 %v1957_v9, %v3766_v23  ;;  %v1830_v63 = vadd.f32 %v2018_v38, %v1733_v2 }
 0x46e   :  { %1862 = vst [vmem:[%s3843_s11 + $0x50] sm:$0xff] %v1830_v63  ;;  %v1833_v29 = vadd.f32 %v2021_v54, %v1736_v13  ;;  %v1958_v27 = vpop.f32.mrb[56].mxu1 }
 0x46f   :  { %v2022_v59 = vpop.f32.mrb[88].mxu0  ;;  %v1959_v58 = vpop.f32.mrb[57].mxu1 }
 0x470   :  { %v2023_v61 = vpop.f32.mrb[89].mxu0  ;;  %1863 = vst [vmem:[%s3843_s11 + $0x58] sm:$0xff] %v1833_v29  ;;  %v1960_v50 = vadd.f32 %v1959_v58, %v1958_v27  ;;  %v1961_v5 = vpop.f32.mrb[58].mxu1 }
 0x471   :  { %v2024_v12 = vadd.f32 %v2023_v61, %v2022_v59  ;;  %v2025_v26 = vpop.f32.mrb[90].mxu0  ;;  %v1962_v57 = vpop.f32.mrb[59].mxu1 }
 0x472   :  { %v2026_v0 = vpop.f32.mrb[91].mxu0  ;;  %v1741_v25 = vadd.f32 %v1960_v50, %v3766_v23  ;;  %v1963_v18 = vadd.f32 %v1962_v57, %v1961_v5 }
 0x473   :  { %v2027_v32 = vadd.f32 %v2026_v0, %v2025_v26 }
 0x474   :  { %v1744_v42 = vadd.f32 %v1963_v18, %v3766_v23  ;;  %v1838_v10 = vadd.f32 %v2024_v12, %v1741_v25 }
 0x476   :  { %1864 = vst [vmem:[%s3843_s11 + $0x60] sm:$0xff] %v1838_v10  ;;  %v1841_v6 = vadd.f32 %v2027_v32, %v1744_v42  ;;  %v1964_v39 = vpop.f32.mrb[60].mxu1 }
 0x477   :  { %v1965_v41 = vpop.f32.mrb[61].mxu1 }
 0x478   :  { %1865 = vst [vmem:[%s3843_s11 + $0x68] sm:$0xff] %v1841_v6  ;;  %v1966_v53 = vadd.f32 %v1965_v41, %v1964_v39  ;;  %v1967_v52 = vpop.f32.mrb[62].mxu1 }
 0x479   :  { %v1968_v20 = vpop.f32.mrb[63].mxu1 }
 0x47a   :  { %v1969_v31 = vadd.f32 %v1968_v20, %v1967_v52  ;;  %v1749_v34 = vadd.f32 %v1966_v53, %v3766_v23 }
 0x47c   :  { %v1752_v55 = vadd.f32 %v1969_v31, %v3766_v23 }
 0x47e   :  { %v2028_v21 = vpop.f32.mrb[64].mxu1 }
 0x47f   :  { %v2029_v47 = vpop.f32.mrb[65].mxu1 }
 0x480   :  { %v2030_v49 = vadd.f32 %v2029_v47, %v2028_v21  ;;  %v2031_v3 = vpop.f32.mrb[66].mxu1 }
 0x481   :  { %v2032_v24 = vpop.f32.mrb[67].mxu1 }
 0x482   :  { %v1846_v33 = vadd.f32 %v2030_v49, %v1749_v34  ;;  %v2033_v19 = vadd.f32 %v2032_v24, %v2031_v3 }
 0x484   :  { %1866 = vst [vmem:[%s3843_s11 + $0x70] sm:$0xff] %v1846_v33  ;;  %v1849_v56 = vadd.f32 %v2033_v19, %v1752_v55 }
 0x486   :  { %1867 = vst [vmem:[%s3843_s11 + $0x78] sm:$0xff] %v1849_v56 }
 0x487   :  { %1872 = vsyncmov [#allocation4] }
 0x48a   :  { %s1873_s10 = vpop.sfrf %1872 }
 0x48b   :  { %p1904_p8 = scmp.ne.s32.totalorder %s1873_s10, 0 }
 0x48d   :  { %1877 = shalt.err (%p1904_p8)  }
 0x48e   :  { %1879 = vsyncmov [#allocation4 + $0x1] }
 0x491   :  { %s1880_s18 = vpop.sfrf %1879 }
 0x492   :  { %p1905_p9 = scmp.ne.s32.totalorder %s1880_s18, 0 }
 0x494   :  { %1884 = shalt.err (%p1905_p9)  }

</bundles_post_ra>
